<compile_context>
chip_gen: v7x
topology: tpu7x:2x2x1
jax: 0.10.0
libtpu: 0.0.40
codegen_flags: <defaults>
</compile_context>

<pallas_src>
import jax
import jax.numpy as jnp
from jax.experimental import pallas as pl
from jax.experimental.pallas import tpu as pltpu


def _round_up(x, m):
    return ((x + m - 1) // m) * m


# ---------------------------------------------------------------------------
# Pallas kernel: fused trilinear blend, spatial axis on lanes.
#   corners_ref : (1, 8, C, TL)  packed corner samples, corner index k = bd*4+bh*2+bw
#   frac_ref    : (1, 3, TL)     fractional offsets (fd, fh, fw)
#   o_ref       : (1, C, TL)
# ---------------------------------------------------------------------------
def _trilinear_blend_kernel(corners_ref, frac_ref, o_ref):
    fr = frac_ref[0].astype(jnp.float32)          # (3, TL)
    fd, fh, fw = fr[0:1], fr[1:2], fr[2:3]        # (1, TL) each
    gd, gh, gw = 1.0 - fd, 1.0 - fh, 1.0 - fw
    weights = (gd * gh * gw, gd * gh * fw, gd * fh * gw, gd * fh * fw,
               fd * gh * gw, fd * gh * fw, fd * fh * gw, fd * fh * fw)
    acc = corners_ref[0, 0].astype(jnp.float32) * weights[0]     # (C, TL)
    for k in range(1, 8):
        acc = acc + corners_ref[0, k].astype(jnp.float32) * weights[k]
    o_ref[0] = acc.astype(o_ref.dtype)


def _blend_pallas(corners, fracs, out_dtype, max_lane_tile=8192):
    """corners: (N, 8, C, Msp), fracs: (N, 3, Msp) -> (N, C, Msp)."""
    N, K, C, Msp = corners.shape
    assert K == 8
    tl = min(max_lane_tile, _round_up(Msp, 128))   # shape-aware lane tile
    Mp = _round_up(Msp, tl)
    if Mp != Msp:
        corners = jnp.pad(corners, ((0, 0), (0, 0), (0, 0), (0, Mp - Msp)))
        fracs = jnp.pad(fracs, ((0, 0), (0, 0), (0, Mp - Msp)))
    out = pl.pallas_call(
        _trilinear_blend_kernel,
        out_shape=jax.ShapeDtypeStruct((N, C, Mp), out_dtype),
        grid=(N, Mp // tl),
        in_specs=[
            pl.BlockSpec((1, 8, C, tl), lambda n, j: (n, 0, 0, j)),
            pl.BlockSpec((1, 3, tl), lambda n, j: (n, 0, j)),
        ],
        out_specs=pl.BlockSpec((1, C, tl), lambda n, j: (n, 0, j)),
        compiler_params=pltpu.CompilerParams(
            dimension_semantics=("parallel", "parallel"),
            vmem_limit_bytes=32 * 1024 * 1024),
    )(corners, fracs)
    return out[:, :, :Msp]


# ---------------------------------------------------------------------------
# Corner gather (data-dependent; stays in XLA) + coordinate / frac preparation.
# ---------------------------------------------------------------------------
def _prepare_corners_3d(moving, flow):
    N, C, D, H, W = moving.shape
    Msp = D * H * W
    flow = flow.astype(jnp.float32)

    gd, gh, gw = jnp.meshgrid(jnp.arange(D, dtype=jnp.float32),
                              jnp.arange(H, dtype=jnp.float32),
                              jnp.arange(W, dtype=jnp.float32), indexing="ij")
    loc_d = gd[None] - flow[:, 0]                 # (N, D, H, W)
    loc_h = gh[None] - flow[:, 1]
    loc_w = gw[None] - flow[:, 2]
    d0f, h0f, w0f = jnp.floor(loc_d), jnp.floor(loc_h), jnp.floor(loc_w)
    fracs = jnp.stack([(loc_d - d0f).reshape(N, Msp),
                       (loc_h - h0f).reshape(N, Msp),
                       (loc_w - w0f).reshape(N, Msp)], axis=1)   # (N, 3, Msp)
    d0 = d0f.astype(jnp.int32)
    h0 = h0f.astype(jnp.int32)
    w0 = w0f.astype(jnp.int32)

    mov_flat = moving.reshape(N, C, Msp)          # spatial on the fast axis

    def corner(dd, hh, ww):
        inb = (dd >= 0) & (dd < D) & (hh >= 0) & (hh < H) & (ww >= 0) & (ww < W)
        idx = (jnp.clip(dd, 0, D - 1) * H + jnp.clip(hh, 0, H - 1)) * W \
              + jnp.clip(ww, 0, W - 1)
        v = jnp.take_along_axis(mov_flat, idx.reshape(N, 1, Msp), axis=2)
        return v * inb.reshape(N, 1, Msp).astype(v.dtype)        # zeros padding

    corners = jnp.stack(
        [corner(d0 + bd, h0 + bh, w0 + bw)
         for bd in (0, 1) for bh in (0, 1) for bw in (0, 1)],
        axis=1)                                    # (N, 8, C, Msp)
    return corners, fracs


# ---------------------------------------------------------------------------
# RegisterWithGivenFlow.forward
# ---------------------------------------------------------------------------
def register_with_given_flow(moving_image, flow_move_to_register):
    """JAX/Pallas equivalent of RegisterWithGivenFlow.forward (3-D, trilinear)."""
    assert moving_image.ndim == 5 and flow_move_to_register.shape[1] == 3
    N, C, D, H, W = moving_image.shape
    corners, fracs = _prepare_corners_3d(moving_image, flow_move_to_register)
    out = _blend_pallas(corners, fracs, moving_image.dtype)
    return out.reshape(N, C, D, H, W)


# Pure-JAX reference (same math, no Pallas) for an in-script numerical check.
def _reference_register(moving_image, flow_move_to_register):
    N, C, D, H, W = moving_image.shape
    corners, fracs = _prepare_corners_3d(moving_image, flow_move_to_register)
    fd, fh, fw = fracs[:, 0:1], fracs[:, 1:2], fracs[:, 2:3]     # (N, 1, Msp)
    gd, gh, gw = 1.0 - fd, 1.0 - fh, 1.0 - fw
    ws = [gd * gh * gw, gd * gh * fw, gd * fh * gw, gd * fh * fw,
          fd * gh * gw, fd * gh * fw, fd * fh * gw, fd * fh * fw]
    out = sum(corners[:, k] * ws[k] for k in range(8))           # (N, C, Msp)
    return out.reshape(N, C, D, H, W).astype(moving_image.dtype)


# ---------------------------------------------------------------------------
if __name__ == "__main__":
    N, C, D, H, W = 2, 4, 16, 16, 16

    key = jax.random.PRNGKey(0)
    k_mov, k_flow = jax.random.split(key)
    moving = jax.random.normal(k_mov, (N, C, D, H, W), jnp.float32)
    # Displacements of a few voxels; some samples land out of bounds (zeros padding).
    flow = 2.5 * jax.random.normal(k_flow, (N, 3, D, H, W), jnp.float32)

    fwd = jax.jit(register_with_given_flow)
    registered = fwd(moving, flow)
    jax.block_until_ready(registered)

    assert registered.shape == (N, C, D, H, W)
    ref = _reference_register(moving, flow)
    err = float(jnp.max(jnp.abs(registered - ref)))
    assert err < 1e-4, f"max abs error vs reference: {err}"
    print("KERNEL_OK")
</pallas_src>

<mosaic_0001>
module attributes {stable_mosaic.version = 11 : i64} {
  func.func private @main(%arg0: i32) attributes {dimension_semantics = [#tpu.dimension_semantics<core_parallel>], iteration_bounds = array<i64: 2>, tpu.core_type = #tpu.core_type<sc_scalar_subcore>, window_params = []} {
    return
  }
}

module attributes {stable_mosaic.version = 11 : i64} {
  func.func private @main(%arg0: i32) attributes {dimension_semantics = [#tpu.dimension_semantics<core_parallel>], iteration_bounds = array<i64: 2>, tpu.core_type = #tpu.core_type<sc_scalar_subcore>, window_params = []} {
    return
  }
}

module attributes {stable_mosaic.version = 11 : i64} {
  func.func @_trilinear_blend_kernel(%arg0: i32, %arg1: i32, %arg2: memref<1x8x4x4096xf32, #tpu.memory_space<vmem>>, %arg3: memref<1x3x4096xf32, #tpu.memory_space<vmem>>, %arg4: memref<1x4x4096xf32, #tpu.memory_space<vmem>>) attributes {dimension_semantics = [#tpu.dimension_semantics<parallel>, #tpu.dimension_semantics<parallel>], iteration_bounds = array<i64: 2, 1>, scalar_prefetch = 0 : i64, scratch_operands = 0 : i64, tpu.core_type = #tpu.core_type<tc>, window_params = [{transform_indices = @transform_0, window_bounds = array<i64: 1, 8, 4, 4096>}, {transform_indices = @transform_1, window_bounds = array<i64: 1, 3, 4096>}, {transform_indices = @transform_2, window_bounds = array<i64: 1, 4, 4096>}]} {
    %c0 = arith.constant 0 : index
    %c0_0 = arith.constant 0 : index
    %c0_1 = arith.constant 0 : index
    %0 = vector.load %arg3[%c0, %c0_0, %c0_1] : memref<1x3x4096xf32, #tpu.memory_space<vmem>>, vector<1x3x4096xf32>
    %1 = vector.shape_cast %0 : vector<1x3x4096xf32> to vector<3x4096xf32>
    %2 = vector.extract_strided_slice %1 {offsets = [0, 0], sizes = [1, 4096], strides = [1, 1]} : vector<3x4096xf32> to vector<1x4096xf32>
    %3 = vector.extract_strided_slice %1 {offsets = [1, 0], sizes = [1, 4096], strides = [1, 1]} : vector<3x4096xf32> to vector<1x4096xf32>
    %4 = vector.extract_strided_slice %1 {offsets = [2, 0], sizes = [1, 4096], strides = [1, 1]} : vector<3x4096xf32> to vector<1x4096xf32>
    %cst = arith.constant 1.000000e+00 : f32
    %5 = vector.broadcast %cst : f32 to vector<1x4096xf32>
    %6 = arith.subf %5, %2 : vector<1x4096xf32>
    %cst_2 = arith.constant 1.000000e+00 : f32
    %7 = vector.broadcast %cst_2 : f32 to vector<1x4096xf32>
    %8 = arith.subf %7, %3 : vector<1x4096xf32>
    %cst_3 = arith.constant 1.000000e+00 : f32
    %9 = vector.broadcast %cst_3 : f32 to vector<1x4096xf32>
    %10 = arith.subf %9, %4 : vector<1x4096xf32>
    %11 = arith.mulf %6, %8 : vector<1x4096xf32>
    %12 = arith.mulf %11, %10 : vector<1x4096xf32>
    %13 = arith.mulf %6, %8 : vector<1x4096xf32>
    %14 = arith.mulf %13, %4 : vector<1x4096xf32>
    %15 = arith.mulf %6, %3 : vector<1x4096xf32>
    %16 = arith.mulf %15, %10 : vector<1x4096xf32>
    %17 = arith.mulf %6, %3 : vector<1x4096xf32>
    %18 = arith.mulf %17, %4 : vector<1x4096xf32>
    %19 = arith.mulf %2, %8 : vector<1x4096xf32>
    %20 = arith.mulf %19, %10 : vector<1x4096xf32>
    %21 = arith.mulf %2, %8 : vector<1x4096xf32>
    %22 = arith.mulf %21, %4 : vector<1x4096xf32>
    %23 = arith.mulf %2, %3 : vector<1x4096xf32>
    %24 = arith.mulf %23, %10 : vector<1x4096xf32>
    %25 = arith.mulf %2, %3 : vector<1x4096xf32>
    %26 = arith.mulf %25, %4 : vector<1x4096xf32>
    %c0_4 = arith.constant 0 : index
    %c0_5 = arith.constant 0 : index
    %c0_6 = arith.constant 0 : index
    %c0_7 = arith.constant 0 : index
    %27 = vector.load %arg2[%c0_4, %c0_5, %c0_6, %c0_7] : memref<1x8x4x4096xf32, #tpu.memory_space<vmem>>, vector<1x1x4x4096xf32>
    %28 = vector.shape_cast %27 : vector<1x1x4x4096xf32> to vector<4x4096xf32>
    %29 = vector.broadcast %12 : vector<1x4096xf32> to vector<4x4096xf32>
    %30 = arith.mulf %28, %29 : vector<4x4096xf32>
    %c0_8 = arith.constant 0 : index
    %c1 = arith.constant 1 : index
    %c0_9 = arith.constant 0 : index
    %c0_10 = arith.constant 0 : index
    %31 = vector.load %arg2[%c0_8, %c1, %c0_9, %c0_10] : memref<1x8x4x4096xf32, #tpu.memory_space<vmem>>, vector<1x1x4x4096xf32>
    %32 = vector.shape_cast %31 : vector<1x1x4x4096xf32> to vector<4x4096xf32>
    %33 = vector.broadcast %14 : vector<1x4096xf32> to vector<4x4096xf32>
    %34 = arith.mulf %32, %33 : vector<4x4096xf32>
    %35 = arith.addf %30, %34 : vector<4x4096xf32>
    %c0_11 = arith.constant 0 : index
    %c2 = arith.constant 2 : index
    %c0_12 = arith.constant 0 : index
    %c0_13 = arith.constant 0 : index
    %36 = vector.load %arg2[%c0_11, %c2, %c0_12, %c0_13] : memref<1x8x4x4096xf32, #tpu.memory_space<vmem>>, vector<1x1x4x4096xf32>
    %37 = vector.shape_cast %36 : vector<1x1x4x4096xf32> to vector<4x4096xf32>
    %38 = vector.broadcast %16 : vector<1x4096xf32> to vector<4x4096xf32>
    %39 = arith.mulf %37, %38 : vector<4x4096xf32>
    %40 = arith.addf %35, %39 : vector<4x4096xf32>
    %c0_14 = arith.constant 0 : index
    %c3 = arith.constant 3 : index
    %c0_15 = arith.constant 0 : index
    %c0_16 = arith.constant 0 : index
    %41 = vector.load %arg2[%c0_14, %c3, %c0_15, %c0_16] : memref<1x8x4x4096xf32, #tpu.memory_space<vmem>>, vector<1x1x4x4096xf32>
    %42 = vector.shape_cast %41 : vector<1x1x4x4096xf32> to vector<4x4096xf32>
    %43 = vector.broadcast %18 : vector<1x4096xf32> to vector<4x4096xf32>
    %44 = arith.mulf %42, %43 : vector<4x4096xf32>
    %45 = arith.addf %40, %44 : vector<4x4096xf32>
    %c0_17 = arith.constant 0 : index
    %c4 = arith.constant 4 : index
    %c0_18 = arith.constant 0 : index
    %c0_19 = arith.constant 0 : index
    %46 = vector.load %arg2[%c0_17, %c4, %c0_18, %c0_19] : memref<1x8x4x4096xf32, #tpu.memory_space<vmem>>, vector<1x1x4x4096xf32>
    %47 = vector.shape_cast %46 : vector<1x1x4x4096xf32> to vector<4x4096xf32>
    %48 = vector.broadcast %20 : vector<1x4096xf32> to vector<4x4096xf32>
    %49 = arith.mulf %47, %48 : vector<4x4096xf32>
    %50 = arith.addf %45, %49 : vector<4x4096xf32>
    %c0_20 = arith.constant 0 : index
    %c5 = arith.constant 5 : index
    %c0_21 = arith.constant 0 : index
    %c0_22 = arith.constant 0 : index
    %51 = vector.load %arg2[%c0_20, %c5, %c0_21, %c0_22] : memref<1x8x4x4096xf32, #tpu.memory_space<vmem>>, vector<1x1x4x4096xf32>
    %52 = vector.shape_cast %51 : vector<1x1x4x4096xf32> to vector<4x4096xf32>
    %53 = vector.broadcast %22 : vector<1x4096xf32> to vector<4x4096xf32>
    %54 = arith.mulf %52, %53 : vector<4x4096xf32>
    %55 = arith.addf %50, %54 : vector<4x4096xf32>
    %c0_23 = arith.constant 0 : index
    %c6 = arith.constant 6 : index
    %c0_24 = arith.constant 0 : index
    %c0_25 = arith.constant 0 : index
    %56 = vector.load %arg2[%c0_23, %c6, %c0_24, %c0_25] : memref<1x8x4x4096xf32, #tpu.memory_space<vmem>>, vector<1x1x4x4096xf32>
    %57 = vector.shape_cast %56 : vector<1x1x4x4096xf32> to vector<4x4096xf32>
    %58 = vector.broadcast %24 : vector<1x4096xf32> to vector<4x4096xf32>
    %59 = arith.mulf %57, %58 : vector<4x4096xf32>
    %60 = arith.addf %55, %59 : vector<4x4096xf32>
    %c0_26 = arith.constant 0 : index
    %c7 = arith.constant 7 : index
    %c0_27 = arith.constant 0 : index
    %c0_28 = arith.constant 0 : index
    %61 = vector.load %arg2[%c0_26, %c7, %c0_27, %c0_28] : memref<1x8x4x4096xf32, #tpu.memory_space<vmem>>, vector<1x1x4x4096xf32>
    %62 = vector.shape_cast %61 : vector<1x1x4x4096xf32> to vector<4x4096xf32>
    %63 = vector.broadcast %26 : vector<1x4096xf32> to vector<4x4096xf32>
    %64 = arith.mulf %62, %63 : vector<4x4096xf32>
    %65 = arith.addf %60, %64 : vector<4x4096xf32>
    %c0_29 = arith.constant 0 : index
    %c0_30 = arith.constant 0 : index
    %c0_31 = arith.constant 0 : index
    %66 = vector.load %arg4[%c0_29, %c0_30, %c0_31] : memref<1x4x4096xf32, #tpu.memory_space<vmem>>, vector<1x4x4096xf32>
    %67 = vector.shape_cast %66 : vector<1x4x4096xf32> to vector<4x4096xf32>
    %68 = vector.shape_cast %65 : vector<4x4096xf32> to vector<1x4x4096xf32>
    tpu.vector_store %arg4[%c0_29, %c0_30, %c0_31], %68 {strides = array<i32>} : memref<1x4x4096xf32, #tpu.memory_space<vmem>>, vector<1x4x4096xf32>,
    return
  }
  func.func @transform_0(%arg0: i32, %arg1: i32) -> (i32, i32, i32, i32) {
    %c0_i32 = arith.constant 0 : i32
    %c0_i32_0 = arith.constant 0 : i32
    %c0_i32_1 = arith.constant 0 : i32
    return %arg0, %c0_i32, %c0_i32_0, %arg1 : i32, i32, i32, i32
  }
  func.func @transform_1(%arg0: i32, %arg1: i32) -> (i32, i32, i32) {
    %c0_i32 = arith.constant 0 : i32
    %c0_i32_0 = arith.constant 0 : i32
    return %arg0, %c0_i32, %arg1 : i32, i32, i32
  }
  func.func @transform_2(%arg0: i32, %arg1: i32) -> (i32, i32, i32) {
    %c0_i32 = arith.constant 0 : i32
    %c0_i32_0 = arith.constant 0 : i32
    return %arg0, %c0_i32, %arg1 : i32, i32, i32
  }
}

</mosaic_0001>

<bundles_post_ra>
// kernel: register_with_given_flow.1
= control target key start
LH: loop header
LB: loop body
LE: loop exit
PB: predicated region body
PF: predicated region fallthrough
CT: control target
= control target key end

     0   :  { %s4298_s9 = smov 0   ;;  %s4300_s10 = smov 0   ;;  %s6572_s0 = inlined_call_operand.vmem [shape: f32[2,8,4,4096], index: 0, kind: input, shape index: {}]   ;;  %s6573_s1 = inlined_call_operand.vmem [shape: f32[2,3,4096], index: 1, kind: input, shape index: {}]   ;;  %s6574_s2 = inlined_call_operand.vmem [shape: f32[2,4,4096], index: 2, kind: output, shape index: {}]  }
   0x1   :  { %s4302_s11 = smov 0  }
   0x2 LB: > { %s24_s12 = sadd.s32 1, %s4277_s10  ;;  %p4111_p0 = scmp.ge.s32.totalorder %s4281_s11, 1  ;;  %s4281_s11 = sphi %s4302_s11, %s12_s11   ;;  %s4277_s10 = sphi %s4300_s10, %s7288_s10   ;;  %s4273_s9 = sphi %s4298_s9, %s7287_s9  }
   0x3   : > { %p26_p1 = scmp.ge.s32.totalorder %s24_s12, 2  ;;  %p150_p2 = scmp.lt.s32.totalorder %s4281_s11, 3 }
   0x5   : > { %s7290_s12 = smov (%p26_p1, %s24_s12), 0  ;;  %p151_p3 = pnand %p4111_p0, %p150_p2 }
   0x7   : > { %154 = sbr.rel (%p151_p3) target bundleno = 364 (0x16c), region = 28 }
   0xe   : > { %p190_p4 = scmp.lt.s32.totalorder %s4273_s9, 1  ;;  %v699_v0 = vlaneseq }
  0x10   : > { %s7292_s9 = smov (!%p190_p4, %s4273_s9), 1  ;;  %v700_v1 = vshrl.u32 %v699_v0, 7 }
  0x11   : > { %s4233_s13 = sshll.u32 %s7292_s9, 7  ;;  %s4232_s17 = sshll.u32 %s7292_s9, 10 }
  0x12   : > { %s207_s16 = scalar_lea.vmem %s6573_s1, %s4233_s13  ;;  %v4324_v2 = vsub.s32 0, %v700_v1  ;;  %v4326_v3 = vsub.s32 4, %v700_v1  ;;  %s5274_s20 = scalar_lea.vmem %s6572_s0, %s4232_s17 }
  0x13   : > { %v4328_v4 = vld [vmem:[%s207_s16] sm:$0x77]  ;;  %v4330_v5 = vld [vmem:[%s207_s16 + $0x8] sm:$0x77]  ;;  %v4332_v6 = vld [vmem:[%s207_s16 + $0x10] sm:$0x77]  ;;  %s6529_s23 = scalar_lea.vmem %s6574_s2, %s4233_s13 }
  0x14   : > { %6799 = vst [vmem:[#allocation2_spill] sm:$0xff] %v4324_v2  ;;  %6800 = vst [vmem:[#allocation3_spill] sm:$0xff] %v4326_v3  ;;  %v4334_v7 = vld [vmem:[%s207_s16 + $0x18] sm:$0x77]  ;;  %v4336_v8 = vld [vmem:[%s207_s16 + $0x20] sm:$0x77] }
  0x15   : > { %v4338_v9 = vld [vmem:[%s207_s16 + $0x28] sm:$0x77]  ;;  %v4340_v10 = vld [vmem:[%s207_s16 + $0x30] sm:$0x77]  ;;  %v4342_v11 = vld [vmem:[%s207_s16 + $0x38] sm:$0x77] }
  0x16   : > { %v4344_v12 = vld [vmem:[%s207_s16 + $0x40] sm:$0x77]  ;;  %v4346_v13 = vld [vmem:[%s207_s16 + $0x48] sm:$0x77]  ;;  %v4348_v14 = vld [vmem:[%s207_s16 + $0x50] sm:$0x77] }
  0x17   : > { %6801 = vst [vmem:[#allocation4_spill] sm:$0xff] %v4344_v12  ;;  %v4350_v15 = vld [vmem:[%s207_s16 + $0x58] sm:$0x77]  ;;  %v4352_v16 = vld [vmem:[%s207_s16 + $0x60] sm:$0x77]  ;;  %v4361_v20 = vsub.f32 1.0, %v4328_v4 }
  0x18   : > { %6802 = vst [vmem:[#allocation5_spill] sm:$0xff] %v4350_v15  ;;  %6803 = vst [vmem:[#allocation6_spill] sm:$0xff] %v4352_v16  ;;  %v4354_v17 = vld [vmem:[%s207_s16 + $0x68] sm:$0x77]  ;;  %v4356_v18 = vld [vmem:[%s207_s16 + $0x70] sm:$0x77] }
  0x19   : > { %6804 = vst [vmem:[#allocation7_spill] sm:$0xff] %v4354_v17  ;;  %6805 = vst [vmem:[#allocation8_spill] sm:$0xff] %v4356_v18  ;;  %v4358_v19 = vld [vmem:[%s207_s16 + $0x78] sm:$0x77]  ;;  %v4364_v21 = vsub.f32 1.0, %v4330_v5  ;;  %v4367_v22 = vsub.f32 1.0, %v4332_v6 }
  0x1a   : > { %6806 = vst [vmem:[#allocation9_spill] sm:$0xff] %v4358_v19  ;;  %v4370_v23 = vsub.f32 1.0, %v4334_v7  ;;  %v4373_v24 = vsub.f32 1.0, %v4336_v8  ;;  %v4376_v25 = vsub.f32 1.0, %v4338_v9  ;;  %v4379_v26 = vsub.f32 1.0, %v4340_v10 }
  0x1b   : > { %v4382_v27 = vsub.f32 1.0, %v4342_v11  ;;  %v4385_v28 = vsub.f32 1.0, %v4344_v12  ;;  %v4388_v29 = vsub.f32 1.0, %v4346_v13  ;;  %v4391_v30 = vsub.f32 1.0, %v4348_v14 }
  0x1c   : > { %6807 = vst [vmem:[#allocation10_spill] sm:$0xff] %v4376_v25  ;;  %6808 = vst [vmem:[#allocation11_spill] sm:$0xff] %v4379_v26  ;;  %v4394_v31 = vsub.f32 1.0, %v4350_v15  ;;  %v4397_v32 = vsub.f32 1.0, %v4352_v16  ;;  %v4400_v33 = vsub.f32 1.0, %v4354_v17  ;;  %v4403_v34 = vsub.f32 1.0, %v4356_v18 }
  0x1d   : > { %6809 = vst [vmem:[#allocation12_spill] sm:$0xff] %v4382_v27  ;;  %6810 = vst [vmem:[#allocation13_spill] sm:$0xff] %v4385_v28  ;;  %v4406_v35 = vsub.f32 1.0, %v4358_v19  ;;  %v267_v36 = vrot.slane %v4361_v20, 5  ;;  %v269_v37 = vrot.slane %v4364_v21, 5  ;;  %v271_v38 = vrot.slane %v4367_v22, 5 }
  0x1e   : > { %6811 = vst [vmem:[#allocation14_spill] sm:$0xff] %v4388_v29  ;;  %6812 = vst [vmem:[#allocation15_spill] sm:$0xff] %v4391_v30  ;;  %v273_v39 = vrot.slane %v4370_v23, 5  ;;  %v275_v40 = vrot.slane %v4373_v24, 5  ;;  %v277_v41 = vrot.slane %v4376_v25, 5  ;;  %v279_v42 = vrot.slane %v4379_v26, 5 }
  0x1f   : > { %6813 = vst [vmem:[#allocation16_spill] sm:$0xff] %v4394_v31  ;;  %6814 = vst [vmem:[#allocation17_spill] sm:$0xff] %v4397_v32  ;;  %v281_v43 = vrot.slane %v4382_v27, 5  ;;  %v4416_v44 = vrot.slane %v267_v36, 4  ;;  %v4418_v45 = vrot.slane %v269_v37, 4  ;;  %v4420_v46 = vrot.slane %v271_v38, 4 }
  0x20   : > { %6815 = vst [vmem:[#allocation18_spill] sm:$0xff] %v4403_v34  ;;  %v4422_v47 = vrot.slane %v273_v39, 4  ;;  %v4424_v48 = vrot.slane %v275_v40, 4  ;;  %v4426_v49 = vrot.slane %v277_v41, 4  ;;  %v4428_v50 = vrot.slane %v279_v42, 4 }
  0x21   : > { %6816 = vst [vmem:[#allocation19_spill] sm:$0xff] %v4416_v44  ;;  %6817 = vst [vmem:[#allocation20_spill] sm:$0xff] %v4418_v45  ;;  %v4430_v51 = vrot.slane %v281_v43, 4  ;;  %v283_v52 = vrot.slane %v4385_v28, 5  ;;  %v285_v53 = vrot.slane %v4388_v29, 5  ;;  %v287_v54 = vrot.slane %v4391_v30, 5 }
  0x22   : > { %6818 = vst [vmem:[#allocation21_spill] sm:$0xff] %v4420_v46  ;;  %6819 = vst [vmem:[#allocation22_spill] sm:$0xff] %v4422_v47  ;;  %v289_v55 = vrot.slane %v4394_v31, 5  ;;  %v291_v56 = vrot.slane %v4397_v32, 5  ;;  %v293_v57 = vrot.slane %v4400_v33, 5  ;;  %v295_v58 = vrot.slane %v4403_v34, 5 }
  0x23   : > { %6820 = vst [vmem:[#allocation23_spill] sm:$0xff] %v4424_v48  ;;  %6821 = vst [vmem:[#allocation24_spill] sm:$0xff] %v4426_v49  ;;  %v297_v59 = vrot.slane %v4406_v35, 5  ;;  %v4440_v60 = vrot.slane %v283_v52, 4  ;;  %v4442_v61 = vrot.slane %v285_v53, 4  ;;  %v4444_v62 = vrot.slane %v287_v54, 4 }
  0x24   : > { %6822 = vst [vmem:[#allocation25_spill] sm:$0xff] %v4428_v50  ;;  %6823 = vst [vmem:[#allocation26_spill] sm:$0xff] %v4430_v51  ;;  %v4446_v63 = vrot.slane %v289_v55, 4  ;;  %v4448_v0 = vrot.slane %v291_v56, 4  ;;  %v4450_v1 = vrot.slane %v293_v57, 4  ;;  %v4452_v36 = vrot.slane %v295_v58, 4 }
  0x25   : > { %6824 = vst [vmem:[#allocation27_spill] sm:$0xff] %v4440_v60  ;;  %6825 = vst [vmem:[#allocation28_spill] sm:$0xff] %v4442_v61  ;;  %v4454_v37 = vrot.slane %v297_v59, 4  ;;  %v4458_v38 = vmul.f32 %v4416_v44, %v4361_v20  ;;  %v4462_v39 = vmul.f32 %v4418_v45, %v4364_v21  ;;  %v4466_v40 = vmul.f32 %v4420_v46, %v4367_v22 }
  0x26   : > { %6826 = vst [vmem:[#allocation29_spill] sm:$0xff] %v4444_v62  ;;  %6827 = vst [vmem:[#allocation30_spill] sm:$0xff] %v4446_v63  ;;  %v4470_v41 = vmul.f32 %v4422_v47, %v4370_v23  ;;  %v4474_v42 = vmul.f32 %v4424_v48, %v4373_v24  ;;  %v4478_v43 = vmul.f32 %v4426_v49, %v4376_v25 }
  0x27   : > { %6828 = vst [vmem:[#allocation31_spill] sm:$0xff] %v4448_v0  ;;  %6829 = vst [vmem:[#allocation32_spill] sm:$0xff] %v4450_v1  ;;  %v4482_v52 = vmul.f32 %v4428_v50, %v4379_v26  ;;  %v4486_v53 = vmul.f32 %v4430_v51, %v4382_v27  ;;  %v4490_v54 = vmul.f32 %v4440_v60, %v4385_v28  ;;  %v339_v60 = vrot.slane %v4373_v24, 6 }
  0x28   : > { %6830 = vst [vmem:[#allocation33_spill] sm:$0xff] %v4452_v36  ;;  %6831 = vst [vmem:[#allocation34_spill] sm:$0xff] %v4454_v37  ;;  %v4494_v55 = vmul.f32 %v4442_v61, %v4388_v29  ;;  %v4498_v56 = vmul.f32 %v4444_v62, %v4391_v30  ;;  %v4502_v57 = vmul.f32 %v4446_v63, %v4394_v31  ;;  %v331_v62 = vrot.slane %v4361_v20, 6 }
  0x29   : > { %v4506_v58 = vmul.f32 %v4448_v0, %v4397_v32  ;;  %v4510_v59 = vmul.f32 %v4450_v1, %v4400_v33  ;;  %v4514_v3 = vmul.f32 %v4452_v36, %v4403_v34  ;;  %v4518_v2 = vmul.f32 %v4454_v37, %v4406_v35 }
  0x2a   : > { %v333_v63 = vrot.slane %v4364_v21, 6  ;;  %v335_v61 = vrot.slane %v4367_v22, 6  ;;  %v337_v0 = vrot.slane %v4370_v23, 6  ;;  %v341_v1 = vrot.slane %v4376_v25, 6 }
  0x2b   : > { %v343_v51 = vrot.slane %v4379_v26, 6  ;;  %v345_v36 = vrot.slane %v4382_v27, 6  ;;  %v4528_v50 = vrot.slane %v331_v62, 4  ;;  %v4536_v47 = vrot.slane %v339_v60, 4 }
  0x2c   : > { %v4530_v37 = vrot.slane %v333_v63, 4  ;;  %v4532_v49 = vrot.slane %v335_v61, 4  ;;  %v4534_v48 = vrot.slane %v337_v0, 4  ;;  %v4538_v46 = vrot.slane %v341_v1, 4 }
  0x2d   : > { %6832 = vst [vmem:[#allocation35_spill] sm:$0xff] %v4528_v50  ;;  %6836 = vst [vmem:[#allocation39_spill] sm:$0xff] %v4536_v47  ;;  %v4540_v45 = vrot.slane %v343_v51, 4  ;;  %v4542_v44 = vrot.slane %v345_v36, 4  ;;  %v347_v26 = vrot.slane %v4385_v28, 6  ;;  %v349_v27 = vrot.slane %v4388_v29, 6 }
  0x2e   : > { %6833 = vst [vmem:[#allocation36_spill] sm:$0xff] %v4530_v37  ;;  %6834 = vst [vmem:[#allocation37_spill] sm:$0xff] %v4532_v49  ;;  %v351_v62 = vrot.slane %v4391_v30, 6  ;;  %v353_v63 = vrot.slane %v4394_v31, 6  ;;  %v355_v61 = vrot.slane %v4397_v32, 6  ;;  %v357_v0 = vrot.slane %v4400_v33, 6 }
  0x2f   : > { %6835 = vst [vmem:[#allocation38_spill] sm:$0xff] %v4534_v48  ;;  %6837 = vst [vmem:[#allocation40_spill] sm:$0xff] %v4538_v46  ;;  %v359_v60 = vrot.slane %v4403_v34, 6  ;;  %v361_v1 = vrot.slane %v4406_v35, 6  ;;  %v4552_v51 = vrot.slane %v347_v26, 4  ;;  %v4554_v36 = vrot.slane %v349_v27, 4 }
  0x30   : > { %6838 = vst [vmem:[#allocation41_spill] sm:$0xff] %v4540_v45  ;;  %6839 = vst [vmem:[#allocation42_spill] sm:$0xff] %v4542_v44  ;;  %v4556_v25 = vrot.slane %v351_v62, 4  ;;  %v4558_v28 = vrot.slane %v353_v63, 4  ;;  %v4560_v29 = vrot.slane %v355_v61, 4  ;;  %v4562_v30 = vrot.slane %v357_v0, 4 }
  0x31   : > { %6840 = vst [vmem:[#allocation43_spill] sm:$0xff] %v4552_v51  ;;  %6841 = vst [vmem:[#allocation44_spill] sm:$0xff] %v4554_v36  ;;  %v4564_v31 = vrot.slane %v359_v60, 4  ;;  %v4566_v32 = vrot.slane %v361_v1, 4  ;;  %v4570_v34 = vmul.f32 %v4528_v50, %v4458_v38  ;;  %v4574_v26 = vmul.f32 %v4530_v37, %v4462_v39 }
  0x32   : > { %6842 = vst [vmem:[#allocation45_spill] sm:$0xff] %v4556_v25  ;;  %6843 = vst [vmem:[#allocation46_spill] sm:$0xff] %v4558_v28  ;;  %v4578_v27 = vmul.f32 %v4532_v49, %v4466_v40  ;;  %v4582_v62 = vmul.f32 %v4534_v48, %v4470_v41  ;;  %v4586_v63 = vmul.f32 %v4536_v47, %v4474_v42 }
  0x33   : > { %6844 = vst [vmem:[#allocation47_spill] sm:$0xff] %v4560_v29  ;;  %6845 = vst [vmem:[#allocation48_spill] sm:$0xff] %v4562_v30  ;;  %v4590_v61 = vmul.f32 %v4538_v46, %v4478_v43  ;;  %v4594_v0 = vmul.f32 %v4540_v45, %v4482_v52  ;;  %v4598_v60 = vmul.f32 %v4542_v44, %v4486_v53  ;;  %v429_v44 = vrot.slane %v4346_v13, 6 }
  0x34   : > { %6846 = vst [vmem:[#allocation49_spill] sm:$0xff] %v4564_v31  ;;  %6847 = vst [vmem:[#allocation50_spill] sm:$0xff] %v4566_v32  ;;  %v4602_v1 = vmul.f32 %v4552_v51, %v4490_v54  ;;  %v427_v51 = vrot.slane %v4344_v12, 6 }
  0x35   : > { %6848 = vst [vmem:[#allocation51_spill] sm:$0xff] %v4570_v34  ;;  %6849 = vst [vmem:[#allocation52_spill] sm:$0xff] %v4574_v26  ;;  %v419_v26 = vrot.slane %v4336_v8, 6  ;;  %v423_v34 = vrot.slane %v4340_v10, 6 }
  0x36   : > { %6850 = vst [vmem:[#allocation53_spill] sm:$0xff] %v4578_v27  ;;  %6851 = vst [vmem:[#allocation54_spill] sm:$0xff] %v4582_v62  ;;  %v4606_v62 = vmul.f32 %v4554_v36, %v4494_v55  ;;  %v415_v27 = vrot.slane %v4332_v6, 6 }
  0x37   : > { %6852 = vst [vmem:[#allocation55_spill] sm:$0xff] %v4586_v63  ;;  %6853 = vst [vmem:[#allocation56_spill] sm:$0xff] %v4590_v61  ;;  %v4610_v63 = vmul.f32 %v4556_v25, %v4498_v56  ;;  %v4614_v61 = vmul.f32 %v4558_v28, %v4502_v57  ;;  %v4652_v25 = vrot.slane %v423_v34, 4  ;;  %v4664_v34 = vrot.slane %v427_v51, 4 }
  0x38   : > { %6854 = vst [vmem:[#allocation57_spill] sm:$0xff] %v4594_v0  ;;  %6855 = vst [vmem:[#allocation58_spill] sm:$0xff] %v4598_v60  ;;  %v4618_v0 = vmul.f32 %v4560_v29, %v4506_v58  ;;  %v4622_v60 = vmul.f32 %v4562_v30, %v4510_v59  ;;  %v4648_v29 = vrot.slane %v419_v26, 4  ;;  %v439_v26 = vrot.slane %v4356_v18, 6 }
  0x39   : > { %6856 = vst [vmem:[#allocation59_spill] sm:$0xff] %v4602_v1  ;;  %6857 = vst [vmem:[#allocation60_spill] sm:$0xff] %v4606_v62  ;;  %v4626_v1 = vmul.f32 %v4564_v31, %v4514_v3  ;;  %v4630_v62 = vmul.f32 %v4566_v32, %v4518_v2 }
  0x3a   : > { %6858 = vst [vmem:[#allocation61_spill] sm:$0xff] %v4610_v63  ;;  %6859 = vst [vmem:[#allocation62_spill] sm:$0xff] %v4614_v61  ;;  %v411_v63 = vrot.slane %v4328_v4, 6  ;;  %v413_v61 = vrot.slane %v4330_v5, 6  ;;  %v4676_v49 = vrot.slane %v439_v26, 4  ;;  %v483_v26 = vrot.slane %v4336_v8, 5 }
  0x3b   : > { %6860 = vst [vmem:[#allocation63_spill] sm:$0xff] %v4618_v0  ;;  %6861 = vst [vmem:[#allocation64_spill] sm:$0xff] %v4622_v60  ;;  %v417_v0 = vrot.slane %v4334_v7, 6  ;;  %v421_v60 = vrot.slane %v4338_v9, 6 }
  0x3c   : > { %6862 = vst [vmem:[#allocation65_spill] sm:$0xff] %v4626_v1  ;;  %6863 = vst [vmem:[#allocation66_spill] sm:$0xff] %v4630_v62  ;;  %v425_v1 = vrot.slane %v4342_v11, 6  ;;  %v4640_v31 = vrot.slane %v411_v63, 4  ;;  %v4642_v32 = vrot.slane %v413_v61, 4  ;;  %v4644_v62 = vrot.slane %v415_v27, 4 }
  0x3d   : > { %v4646_v30 = vrot.slane %v417_v0, 4  ;;  %v4650_v28 = vrot.slane %v421_v60, 4  ;;  %v431_v63 = vrot.slane %v4348_v14, 6  ;;  %v433_v61 = vrot.slane %v4350_v15, 6 }
  0x3e   : > { %v4654_v36 = vrot.slane %v425_v1, 4  ;;  %v435_v27 = vrot.slane %v4352_v16, 6  ;;  %v437_v0 = vrot.slane %v4354_v17, 6  ;;  %v441_v60 = vrot.slane %v4358_v19, 6 }
  0x3f   : > { %v4666_v1 = vrot.slane %v429_v44, 4  ;;  %v4668_v45 = vrot.slane %v431_v63, 4  ;;  %v4670_v46 = vrot.slane %v433_v61, 4  ;;  %v4682_v50 = vmul.f32 %v4640_v31, %v4458_v38 }
  0x40   : > { %v4672_v47 = vrot.slane %v435_v27, 4  ;;  %v4674_v48 = vrot.slane %v437_v0, 4  ;;  %v4678_v37 = vrot.slane %v441_v60, 4  ;;  %v4686_v44 = vmul.f32 %v4642_v32, %v4462_v39 }
  0x41   : > { %6864 = vst [vmem:[#allocation67_spill] sm:$0xff] %v4682_v50  ;;  %v4690_v51 = vmul.f32 %v4644_v62, %v4466_v40  ;;  %v4694_v63 = vmul.f32 %v4646_v30, %v4470_v41  ;;  %v4698_v61 = vmul.f32 %v4648_v29, %v4474_v42  ;;  %v4702_v38 = vmul.f32 %v4650_v28, %v4478_v43 }
  0x42   : > { %6865 = vst [vmem:[#allocation68_spill] sm:$0xff] %v4686_v44  ;;  %v4706_v39 = vmul.f32 %v4652_v25, %v4482_v52  ;;  %v4710_v40 = vmul.f32 %v4654_v36, %v4486_v53  ;;  %v4714_v41 = vmul.f32 %v4664_v34, %v4490_v54  ;;  %v4718_v42 = vmul.f32 %v4666_v1, %v4494_v55 }
  0x43   : > { %6866 = vst [vmem:[#allocation69_spill] sm:$0xff] %v4690_v51  ;;  %6867 = vst [vmem:[#allocation70_spill] sm:$0xff] %v4694_v63  ;;  %v4722_v43 = vmul.f32 %v4668_v45, %v4498_v56  ;;  %v4726_v52 = vmul.f32 %v4670_v46, %v4502_v57  ;;  %v4730_v53 = vmul.f32 %v4672_v47, %v4506_v58  ;;  %v475_v27 = vrot.slane %v4328_v4, 5 }
  0x44   : > { %6868 = vst [vmem:[#allocation71_spill] sm:$0xff] %v4698_v61  ;;  %6869 = vst [vmem:[#allocation72_spill] sm:$0xff] %v4702_v38  ;;  %v4734_v54 = vmul.f32 %v4674_v48, %v4510_v59  ;;  %v4738_v55 = vmul.f32 %v4676_v49, %v4514_v3  ;;  %v4742_v56 = vmul.f32 %v4678_v37, %v4518_v2  ;;  %v477_v57 = vrot.slane %v4330_v5, 5 }
  0x45   : > { %6870 = vst [vmem:[#allocation73_spill] sm:$0xff] %v4706_v39  ;;  %6871 = vst [vmem:[#allocation74_spill] sm:$0xff] %v4710_v40  ;;  %v479_v0 = vrot.slane %v4332_v6, 5  ;;  %v481_v58 = vrot.slane %v4334_v7, 5  ;;  %v485_v59 = vrot.slane %v4338_v9, 5  ;;  %v487_v60 = vrot.slane %v4340_v10, 5 }
  0x46   : > { %6872 = vst [vmem:[#allocation75_spill] sm:$0xff] %v4714_v41  ;;  %6873 = vst [vmem:[#allocation76_spill] sm:$0xff] %v4718_v42  ;;  %v489_v3 = vrot.slane %v4342_v11, 5  ;;  %v4754_v2 = vrot.slane %v477_v57, 4  ;;  %v491_v41 = vrot.slane %v4344_v12, 5  ;;  %v493_v40 = vrot.slane %v4346_v13, 5 }
  0x47   : > { %6874 = vst [vmem:[#allocation77_spill] sm:$0xff] %v4722_v43  ;;  %6875 = vst [vmem:[#allocation78_spill] sm:$0xff] %v4726_v52  ;;  %v4762_v52 = vrot.slane %v485_v59, 4  ;;  %v4764_v43 = vrot.slane %v487_v60, 4  ;;  %v497_v57 = vrot.slane %v4350_v15, 5  ;;  %v505_v59 = vrot.slane %v4358_v19, 5 }
  0x48   : > { %6876 = vst [vmem:[#allocation79_spill] sm:$0xff] %v4730_v53  ;;  %6877 = vst [vmem:[#allocation80_spill] sm:$0xff] %v4734_v54  ;;  %v4758_v54 = vrot.slane %v481_v58, 4  ;;  %v4760_v53 = vrot.slane %v483_v26, 4  ;;  %v4766_v42 = vrot.slane %v489_v3, 4  ;;  %v501_v58 = vrot.slane %v4354_v17, 5 }
  0x49   : > { %6878 = vst [vmem:[#allocation81_spill] sm:$0xff] %v4738_v55  ;;  %6879 = vst [vmem:[#allocation82_spill] sm:$0xff] %v4742_v56  ;;  %v4752_v55 = vrot.slane %v475_v27, 4  ;;  %v4756_v56 = vrot.slane %v479_v0, 4  ;;  %v495_v27 = vrot.slane %v4348_v14, 5  ;;  %v499_v0 = vrot.slane %v4352_v16, 5 }
  0x4a   : > { %6881 = vst [vmem:[#allocation84_spill] sm:$0xff] %v4754_v2  ;;  %6883 = vst [vmem:[#allocation86_spill] sm:$0xff] %v4758_v54  ;;  %v503_v26 = vrot.slane %v4356_v18, 5  ;;  %v4776_v60 = vrot.slane %v491_v41, 4  ;;  %v4778_v3 = vrot.slane %v493_v40, 4  ;;  %v4782_v38 = vrot.slane %v497_v57, 4 }
  0x4b   : > { %6880 = vst [vmem:[#allocation83_spill] sm:$0xff] %v4752_v55  ;;  %6882 = vst [vmem:[#allocation85_spill] sm:$0xff] %v4756_v56  ;;  %v4780_v39 = vrot.slane %v495_v27, 4  ;;  %v4784_v61 = vrot.slane %v499_v0, 4  ;;  %v4786_v63 = vrot.slane %v501_v58, 4  ;;  %v4790_v44 = vrot.slane %v505_v59, 4 }
  0x4c   : > { %6884 = vst [vmem:[#allocation87_spill] sm:$0xff] %v4760_v53  ;;  %6885 = vst [vmem:[#allocation88_spill] sm:$0xff] %v4762_v52  ;;  %v4788_v51 = vrot.slane %v503_v26, 4  ;;  %v523_v50 = vmul.f32 %v4752_v55, %v4361_v20  ;;  %v524_v41 = vmul.f32 %v4754_v2, %v4364_v21  ;;  %v525_v40 = vmul.f32 %v4756_v56, %v4367_v22  ;;  %v6896_v0 = vld [vmem:[#allocation10_spill] sm:$0xff]  ;;  %v6897_v26 = vld [vmem:[#allocation11_spill] sm:$0xff] }
  0x4d   : > { %6886 = vst [vmem:[#allocation89_spill] sm:$0xff] %v4764_v43  ;;  %6887 = vst [vmem:[#allocation90_spill] sm:$0xff] %v4766_v42  ;;  %v526_v27 = vmul.f32 %v4758_v54, %v4370_v23  ;;  %v527_v57 = vmul.f32 %v4760_v53, %v4373_v24  ;;  %v528_v58 = vmul.f32 %v4762_v52, %v6896_v0  ;;  %v6898_v19 = vld [vmem:[#allocation12_spill] sm:$0xff]  ;;  %v6899_v55 = vld [vmem:[#allocation13_spill] sm:$0xff] }
  0x4e   : > { %6888 = vst [vmem:[#allocation91_spill] sm:$0xff] %v4776_v60  ;;  %6889 = vst [vmem:[#allocation92_spill] sm:$0xff] %v4778_v3  ;;  %v529_v59 = vmul.f32 %v4764_v43, %v6897_v26  ;;  %v530_v20 = vmul.f32 %v4766_v42, %v6898_v19  ;;  %v531_v21 = vmul.f32 %v4776_v60, %v6899_v55  ;;  %v6900_v2 = vld [vmem:[#allocation14_spill] sm:$0xff]  ;;  %v6901_v56 = vld [vmem:[#allocation15_spill] sm:$0xff] }
  0x4f   : > { %6890 = vst [vmem:[#allocation93_spill] sm:$0xff] %v4780_v39  ;;  %6891 = vst [vmem:[#allocation94_spill] sm:$0xff] %v4782_v38  ;;  %v532_v22 = vmul.f32 %v4778_v3, %v6900_v2  ;;  %v533_v23 = vmul.f32 %v4780_v39, %v6901_v56  ;;  %v6902_v54 = vld [vmem:[#allocation16_spill] sm:$0xff]  ;;  %v6903_v53 = vld [vmem:[#allocation17_spill] sm:$0xff]  ;;  %v536_v26 = vmul.f32 %v4786_v63, %v4400_v33 }
  0x50   : > { %6892 = vst [vmem:[#allocation95_spill] sm:$0xff] %v4784_v61  ;;  %6893 = vst [vmem:[#allocation96_spill] sm:$0xff] %v4786_v63  ;;  %v534_v24 = vmul.f32 %v4782_v38, %v6902_v54  ;;  %v535_v0 = vmul.f32 %v4784_v61, %v6903_v53  ;;  %v6904_v43 = vld [vmem:[#allocation18_spill] sm:$0xff]  ;;  %v538_v55 = vmul.f32 %v4790_v44, %v4406_v35  ;;  %v6905_v60 = vld [vmem:[#allocation35_spill] sm:$0xff] }
  0x51   : > { %6894 = vst [vmem:[#allocation97_spill] sm:$0xff] %v4788_v51  ;;  %6895 = vst [vmem:[#allocation98_spill] sm:$0xff] %v4790_v44  ;;  %v537_v19 = vmul.f32 %v4788_v51, %v6904_v43  ;;  %v4825_v2 = vmul.f32 %v523_v50, %v6905_v60  ;;  %v6907_v3 = vld [vmem:[#allocation36_spill] sm:$0xff]  ;;  %v6909_v39 = vld [vmem:[#allocation37_spill] sm:$0xff] }
  0x52   : > { %v4828_v56 = vmul.f32 %v524_v41, %v6907_v3  ;;  %v4831_v54 = vmul.f32 %v525_v40, %v6909_v39  ;;  %v6911_v38 = vld [vmem:[#allocation38_spill] sm:$0xff]  ;;  %v6913_v61 = vld [vmem:[#allocation39_spill] sm:$0xff]  ;;  %v6915_v63 = vld [vmem:[#allocation40_spill] sm:$0xff] }
  0x53   : > { %6906 = vst [vmem:[#allocation10_spill] sm:$0xff] %v4825_v2  ;;  %v4834_v53 = vmul.f32 %v526_v27, %v6911_v38  ;;  %v4837_v33 = vmul.f32 %v527_v57, %v6913_v61  ;;  %v4840_v43 = vmul.f32 %v528_v58, %v6915_v63  ;;  %v6917_v51 = vld [vmem:[#allocation41_spill] sm:$0xff]  ;;  %v6919_v44 = vld [vmem:[#allocation42_spill] sm:$0xff]  ;;  %v6921_v42 = vld [vmem:[#allocation43_spill] sm:$0xff] }
  0x54   : > { %6908 = vst [vmem:[#allocation11_spill] sm:$0xff] %v4828_v56  ;;  %6910 = vst [vmem:[#allocation12_spill] sm:$0xff] %v4831_v54  ;;  %v4843_v35 = vmul.f32 %v529_v59, %v6917_v51  ;;  %v4846_v2 = vmul.f32 %v530_v20, %v6919_v44  ;;  %v4849_v56 = vmul.f32 %v531_v21, %v6921_v42  ;;  %v6923_v52 = vld [vmem:[#allocation44_spill] sm:$0xff]  ;;  %v6925_v38 = vld [vmem:[#allocation45_spill] sm:$0xff] }
  0x55   : > { %6912 = vst [vmem:[#allocation13_spill] sm:$0xff] %v4834_v53  ;;  %6914 = vst [vmem:[#allocation14_spill] sm:$0xff] %v4837_v33  ;;  %v4852_v54 = vmul.f32 %v532_v22, %v6923_v52  ;;  %v4855_v53 = vmul.f32 %v533_v23, %v6925_v38  ;;  %v6927_v61 = vld [vmem:[#allocation46_spill] sm:$0xff]  ;;  %v6929_v63 = vld [vmem:[#allocation47_spill] sm:$0xff] }
  0x56   : > { %6916 = vst [vmem:[#allocation15_spill] sm:$0xff] %v4840_v43  ;;  %6918 = vst [vmem:[#allocation16_spill] sm:$0xff] %v4843_v35  ;;  %v4858_v33 = vmul.f32 %v534_v24, %v6927_v61  ;;  %v4861_v43 = vmul.f32 %v535_v0, %v6929_v63  ;;  %v6931_v51 = vld [vmem:[#allocation48_spill] sm:$0xff]  ;;  %v6933_v44 = vld [vmem:[#allocation49_spill] sm:$0xff] }
  0x57   : > { %6920 = vst [vmem:[#allocation17_spill] sm:$0xff] %v4846_v2  ;;  %6922 = vst [vmem:[#allocation18_spill] sm:$0xff] %v4849_v56  ;;  %v4864_v35 = vmul.f32 %v536_v26, %v6931_v51  ;;  %v4867_v2 = vmul.f32 %v537_v19, %v6933_v44  ;;  %v6935_v42 = vld [vmem:[#allocation50_spill] sm:$0xff] }
  0x58   : > { %6924 = vst [vmem:[#allocation37_spill] sm:$0xff] %v4852_v54  ;;  %6926 = vst [vmem:[#allocation44_spill] sm:$0xff] %v4855_v53  ;;  %v4870_v56 = vmul.f32 %v538_v55, %v6935_v42  ;;  %v4873_v54 = vmul.f32 %v523_v50, %v4640_v31  ;;  %v4876_v53 = vmul.f32 %v524_v41, %v4642_v32 }
  0x59   : > { %6928 = vst [vmem:[#allocation45_spill] sm:$0xff] %v4858_v33  ;;  %6930 = vst [vmem:[#allocation46_spill] sm:$0xff] %v4861_v43  ;;  %v4879_v33 = vmul.f32 %v525_v40, %v4644_v62  ;;  %v4882_v43 = vmul.f32 %v526_v27, %v4646_v30  ;;  %v4894_v50 = vmul.f32 %v530_v20, %v4654_v36 }
  0x5a   : > { %6932 = vst [vmem:[#allocation47_spill] sm:$0xff] %v4864_v35  ;;  %6934 = vst [vmem:[#allocation48_spill] sm:$0xff] %v4867_v2  ;;  %v4885_v35 = vmul.f32 %v527_v57, %v4648_v29  ;;  %v4888_v2 = vmul.f32 %v528_v58, %v4650_v28  ;;  %v4897_v41 = vmul.f32 %v531_v21, %v4664_v34 }
  0x5b   : > { %6936 = vst [vmem:[#allocation49_spill] sm:$0xff] %v4870_v56  ;;  %6937 = vst [vmem:[#allocation50_spill] sm:$0xff] %v4873_v54  ;;  %v4891_v56 = vmul.f32 %v529_v59, %v4652_v25  ;;  %v4900_v40 = vmul.f32 %v532_v22, %v4666_v1  ;;  %v4903_v27 = vmul.f32 %v533_v23, %v4668_v45  ;;  %v6953_v22 = vld [vmem:[#allocation19_spill] sm:$0xff]  ;;  %v6954_v23 = vld [vmem:[#allocation20_spill] sm:$0xff] }
  0x5c   : > { %6938 = vst [vmem:[#allocation99_spill] sm:$0xff] %v4876_v53  ;;  %6939 = vst [vmem:[#allocation100_spill] sm:$0xff] %v4879_v33  ;;  %v4906_v57 = vmul.f32 %v534_v24, %v4670_v46  ;;  %v4909_v58 = vmul.f32 %v535_v0, %v4672_v47  ;;  %v4912_v59 = vmul.f32 %v536_v26, %v4674_v48  ;;  %v6955_v24 = vld [vmem:[#allocation21_spill] sm:$0xff]  ;;  %v6956_v0 = vld [vmem:[#allocation22_spill] sm:$0xff] }
  0x5d   : > { %6940 = vst [vmem:[#allocation101_spill] sm:$0xff] %v4882_v43  ;;  %6941 = vst [vmem:[#allocation102_spill] sm:$0xff] %v4885_v35  ;;  %v4915_v20 = vmul.f32 %v537_v19, %v4676_v49  ;;  %v4918_v21 = vmul.f32 %v538_v55, %v4678_v37  ;;  %v6957_v26 = vld [vmem:[#allocation23_spill] sm:$0xff]  ;;  %v6958_v19 = vld [vmem:[#allocation24_spill] sm:$0xff] }
  0x5e   : > { %6942 = vst [vmem:[#allocation103_spill] sm:$0xff] %v4888_v2  ;;  %6943 = vst [vmem:[#allocation104_spill] sm:$0xff] %v4891_v56  ;;  %v6959_v55 = vld [vmem:[#allocation25_spill] sm:$0xff] }
  0x5f   : > { %6944 = vst [vmem:[#allocation105_spill] sm:$0xff] %v4894_v50  ;;  %6945 = vst [vmem:[#allocation106_spill] sm:$0xff] %v4897_v41  ;;  %v6968_v54 = vld [vmem:[#allocation9_spill] sm:$0xff] }
  0x60   : > { %6946 = vst [vmem:[#allocation107_spill] sm:$0xff] %v4900_v40  ;;  %6947 = vst [vmem:[#allocation108_spill] sm:$0xff] %v4903_v27  ;;  %v571_v40 = vmul.f32 %v6953_v22, %v4328_v4  ;;  %v572_v27 = vmul.f32 %v6954_v23, %v4330_v5  ;;  %v6960_v22 = vld [vmem:[#allocation26_spill] sm:$0xff]  ;;  %v6961_v23 = vld [vmem:[#allocation27_spill] sm:$0xff] }
  0x61   : > { %6948 = vst [vmem:[#allocation109_spill] sm:$0xff] %v4906_v57  ;;  %6949 = vst [vmem:[#allocation110_spill] sm:$0xff] %v4909_v58  ;;  %v573_v57 = vmul.f32 %v6955_v24, %v4332_v6  ;;  %v574_v58 = vmul.f32 %v6956_v0, %v4334_v7  ;;  %v578_v41 = vmul.f32 %v6960_v22, %v4342_v11  ;;  %v6962_v24 = vld [vmem:[#allocation28_spill] sm:$0xff]  ;;  %v6963_v0 = vld [vmem:[#allocation29_spill] sm:$0xff] }
  0x62   : > { %6950 = vst [vmem:[#allocation111_spill] sm:$0xff] %v4912_v59  ;;  %6951 = vst [vmem:[#allocation112_spill] sm:$0xff] %v4915_v20  ;;  %v575_v59 = vmul.f32 %v6957_v26, %v4336_v8  ;;  %v576_v20 = vmul.f32 %v6958_v19, %v4338_v9  ;;  %v579_v50 = vmul.f32 %v6961_v23, %v4344_v12  ;;  %v6964_v26 = vld [vmem:[#allocation30_spill] sm:$0xff]  ;;  %v6965_v19 = vld [vmem:[#allocation31_spill] sm:$0xff] }
  0x63   : > { %6952 = vst [vmem:[#allocation113_spill] sm:$0xff] %v4918_v21  ;;  %v577_v21 = vmul.f32 %v6959_v55, %v4340_v10  ;;  %v580_v56 = vmul.f32 %v6962_v24, %v4346_v13  ;;  %v581_v2 = vmul.f32 %v6963_v0, %v4348_v14  ;;  %v582_v35 = vmul.f32 %v6964_v26, %v4350_v15  ;;  %v6966_v55 = vld [vmem:[#allocation32_spill] sm:$0xff]  ;;  %v6967_v22 = vld [vmem:[#allocation33_spill] sm:$0xff]  ;;  %v6969_v23 = vld [vmem:[#allocation34_spill] sm:$0xff] }
  0x64   : > { %v583_v43 = vmul.f32 %v6965_v19, %v4352_v16  ;;  %v584_v33 = vmul.f32 %v6966_v55, %v4354_v17  ;;  %v585_v53 = vmul.f32 %v6967_v22, %v4356_v18  ;;  %v586_v12 = vmul.f32 %v6969_v23, %v6968_v54  ;;  %v6973_v15 = vld [vmem:[#allocation38_spill] sm:$0xff]  ;;  %v6975_v16 = vld [vmem:[#allocation39_spill] sm:$0xff]  ;;  %v6977_v17 = vld [vmem:[#allocation40_spill] sm:$0xff] }
  0x65   : > { %v4953_v24 = vmul.f32 %v571_v40, %v6905_v60  ;;  %v4956_v0 = vmul.f32 %v572_v27, %v6907_v3  ;;  %v4959_v26 = vmul.f32 %v573_v57, %v6909_v39  ;;  %v4962_v19 = vmul.f32 %v574_v58, %v6973_v15  ;;  %v6979_v18 = vld [vmem:[#allocation41_spill] sm:$0xff]  ;;  %v6981_v60 = vld [vmem:[#allocation42_spill] sm:$0xff]  ;;  %v6983_v3 = vld [vmem:[#allocation43_spill] sm:$0xff] }
  0x66   : > { %v4965_v55 = vmul.f32 %v575_v59, %v6975_v16  ;;  %v4968_v22 = vmul.f32 %v576_v20, %v6977_v17  ;;  %v4971_v23 = vmul.f32 %v577_v21, %v6979_v18 }
  0x67   : > { %6970 = vst [vmem:[#allocation19_spill] sm:$0xff] %v4953_v24  ;;  %6971 = vst [vmem:[#allocation20_spill] sm:$0xff] %v4956_v0  ;;  %v4974_v24 = vmul.f32 %v578_v41, %v6981_v60  ;;  %v4977_v0 = vmul.f32 %v579_v50, %v6983_v3 }
  0x68   : > { %6972 = vst [vmem:[#allocation21_spill] sm:$0xff] %v4959_v26  ;;  %6974 = vst [vmem:[#allocation22_spill] sm:$0xff] %v4962_v19  ;;  %v4980_v26 = vmul.f32 %v580_v56, %v6923_v52  ;;  %v4983_v19 = vmul.f32 %v581_v2, %v6925_v38 }
  0x69   : > { %6976 = vst [vmem:[#allocation23_spill] sm:$0xff] %v4965_v55  ;;  %6978 = vst [vmem:[#allocation24_spill] sm:$0xff] %v4968_v22  ;;  %v4986_v55 = vmul.f32 %v582_v35, %v6927_v61  ;;  %v4989_v22 = vmul.f32 %v583_v43, %v6929_v63 }
  0x6a   : > { %6980 = vst [vmem:[#allocation25_spill] sm:$0xff] %v4971_v23  ;;  %6982 = vst [vmem:[#allocation26_spill] sm:$0xff] %v4974_v24  ;;  %v4992_v23 = vmul.f32 %v584_v33, %v6931_v51  ;;  %v4995_v24 = vmul.f32 %v585_v53, %v6933_v44 }
  0x6b   : > { %6984 = vst [vmem:[#allocation27_spill] sm:$0xff] %v4977_v0  ;;  %6985 = vst [vmem:[#allocation28_spill] sm:$0xff] %v4980_v26  ;;  %v4998_v0 = vmul.f32 %v586_v12, %v6935_v42  ;;  %v5001_v26 = vmul.f32 %v571_v40, %v4640_v31  ;;  %v5022_v40 = vmul.f32 %v578_v41, %v4654_v36 }
  0x6c   : > { %6986 = vst [vmem:[#allocation29_spill] sm:$0xff] %v4983_v19  ;;  %6987 = vst [vmem:[#allocation30_spill] sm:$0xff] %v4986_v55  ;;  %v5004_v19 = vmul.f32 %v572_v27, %v4642_v32  ;;  %v5007_v55 = vmul.f32 %v573_v57, %v4644_v62  ;;  %v5025_v27 = vmul.f32 %v579_v50, %v4664_v34 }
  0x6d   : > { %6988 = vst [vmem:[#allocation31_spill] sm:$0xff] %v4989_v22  ;;  %6989 = vst [vmem:[#allocation32_spill] sm:$0xff] %v4992_v23  ;;  %v5010_v22 = vmul.f32 %v574_v58, %v4646_v30  ;;  %v5013_v23 = vmul.f32 %v575_v59, %v4648_v29  ;;  %v5028_v57 = vmul.f32 %v580_v56, %v4666_v1  ;;  %v7008_v56 = vld [vmem:[#allocation83_spill] sm:$0xff] }
  0x6e   : > { %6990 = vst [vmem:[#allocation33_spill] sm:$0xff] %v4995_v24  ;;  %6991 = vst [vmem:[#allocation9_spill] sm:$0xff] %v4998_v0  ;;  %v5016_v24 = vmul.f32 %v576_v20, %v4650_v28  ;;  %v5019_v0 = vmul.f32 %v577_v21, %v4652_v25  ;;  %v5031_v58 = vmul.f32 %v581_v2, %v4668_v45  ;;  %v7009_v2 = vld [vmem:[#allocation84_spill] sm:$0xff] }
  0x6f   : > { %6992 = vst [vmem:[#allocation34_spill] sm:$0xff] %v5001_v26  ;;  %6993 = vst [vmem:[#allocation38_spill] sm:$0xff] %v5004_v19  ;;  %v5034_v59 = vmul.f32 %v582_v35, %v4670_v46  ;;  %v5037_v20 = vmul.f32 %v583_v43, %v4672_v47  ;;  %v5040_v21 = vmul.f32 %v584_v33, %v4674_v48  ;;  %v7010_v35 = vld [vmem:[#allocation85_spill] sm:$0xff]  ;;  %v7011_v43 = vld [vmem:[#allocation86_spill] sm:$0xff] }
  0x70   : > { %6994 = vst [vmem:[#allocation39_spill] sm:$0xff] %v5007_v55  ;;  %6995 = vst [vmem:[#allocation40_spill] sm:$0xff] %v5010_v22  ;;  %v5043_v41 = vmul.f32 %v585_v53, %v4676_v49  ;;  %v5046_v50 = vmul.f32 %v586_v12, %v4678_v37  ;;  %v7012_v33 = vld [vmem:[#allocation87_spill] sm:$0xff]  ;;  %v7013_v53 = vld [vmem:[#allocation88_spill] sm:$0xff] }
  0x71   : > { %6996 = vst [vmem:[#allocation41_spill] sm:$0xff] %v5013_v23  ;;  %6997 = vst [vmem:[#allocation42_spill] sm:$0xff] %v5016_v24  ;;  %v7014_v12 = vld [vmem:[#allocation89_spill] sm:$0xff]  ;;  %v7024_v24 = vld [vmem:[#allocation7_spill] sm:$0xff] }
  0x72   : > { %6998 = vst [vmem:[#allocation43_spill] sm:$0xff] %v5019_v0  ;;  %6999 = vst [vmem:[#allocation114_spill] sm:$0xff] %v5022_v40  ;;  %v7020_v40 = vld [vmem:[#allocation5_spill] sm:$0xff]  ;;  %v7022_v0 = vld [vmem:[#allocation6_spill] sm:$0xff] }
  0x73   : > { %7000 = vst [vmem:[#allocation115_spill] sm:$0xff] %v5025_v27  ;;  %7001 = vst [vmem:[#allocation116_spill] sm:$0xff] %v5028_v57  ;;  %v619_v57 = vmul.f32 %v7008_v56, %v4328_v4  ;;  %v7015_v4 = vld [vmem:[#allocation90_spill] sm:$0xff]  ;;  %v7016_v27 = vld [vmem:[#allocation4_spill] sm:$0xff] }
  0x74   : > { %7002 = vst [vmem:[#allocation117_spill] sm:$0xff] %v5031_v58  ;;  %7003 = vst [vmem:[#allocation118_spill] sm:$0xff] %v5034_v59  ;;  %v620_v58 = vmul.f32 %v7009_v2, %v4330_v5  ;;  %v621_v59 = vmul.f32 %v7010_v35, %v4332_v6  ;;  %v626_v56 = vmul.f32 %v7015_v4, %v4342_v11  ;;  %v7017_v5 = vld [vmem:[#allocation91_spill] sm:$0xff]  ;;  %v7018_v6 = vld [vmem:[#allocation92_spill] sm:$0xff] }
  0x75   : > { %7004 = vst [vmem:[#allocation119_spill] sm:$0xff] %v5037_v20  ;;  %7005 = vst [vmem:[#allocation120_spill] sm:$0xff] %v5040_v21  ;;  %v622_v20 = vmul.f32 %v7011_v43, %v4334_v7  ;;  %v623_v21 = vmul.f32 %v7012_v33, %v4336_v8  ;;  %v627_v2 = vmul.f32 %v7017_v5, %v7016_v27  ;;  %v7019_v7 = vld [vmem:[#allocation93_spill] sm:$0xff]  ;;  %v7021_v8 = vld [vmem:[#allocation94_spill] sm:$0xff] }
  0x76   : > { %7006 = vst [vmem:[#allocation121_spill] sm:$0xff] %v5043_v41  ;;  %7007 = vst [vmem:[#allocation122_spill] sm:$0xff] %v5046_v50  ;;  %v624_v41 = vmul.f32 %v7013_v53, %v4338_v9  ;;  %v625_v50 = vmul.f32 %v7014_v12, %v4340_v10  ;;  %v628_v35 = vmul.f32 %v7018_v6, %v4346_v13  ;;  %v7023_v9 = vld [vmem:[#allocation95_spill] sm:$0xff]  ;;  %v7025_v10 = vld [vmem:[#allocation96_spill] sm:$0xff] }
  0x77   : > { %v629_v43 = vmul.f32 %v7019_v7, %v4348_v14  ;;  %v630_v33 = vmul.f32 %v7021_v8, %v7020_v40  ;;  %v631_v53 = vmul.f32 %v7023_v9, %v7022_v0  ;;  %v632_v12 = vmul.f32 %v7025_v10, %v7024_v24  ;;  %v7026_v23 = vld [vmem:[#allocation8_spill] sm:$0xff]  ;;  %v7027_v11 = vld [vmem:[#allocation97_spill] sm:$0xff]  ;;  %v7028_v27 = vld [vmem:[#allocation98_spill] sm:$0xff] }
  0x78   : > { %v633_v4 = vmul.f32 %v7027_v11, %v7026_v23  ;;  %v634_v5 = vmul.f32 %v7028_v27, %v6968_v54  ;;  %v7029_v22 = vld [vmem:[#allocation35_spill] sm:$0xff]  ;;  %v7031_v6 = vld [vmem:[#allocation36_spill] sm:$0xff]  ;;  %v5087_v40 = vmul.f32 %v621_v59, %v6909_v39  ;;  %v5090_v0 = vmul.f32 %v622_v20, %v6973_v15  ;;  %v7071_v9 = vld [vmem:[#allocation57_spill] sm:$0xff] }
  0x79   : > { %v5081_v13 = vmul.f32 %v619_v57, %v7029_v22  ;;  %v5084_v14 = vmul.f32 %v620_v58, %v7031_v6  ;;  %v5093_v24 = vmul.f32 %v623_v21, %v6975_v16  ;;  %v5096_v23 = vmul.f32 %v624_v41, %v6977_v17  ;;  %v7073_v27 = vld [vmem:[#allocation59_spill] sm:$0xff] }
  0x7a   : > { %7033 = vst [vmem:[#allocation85_spill] sm:$0xff] %v5087_v40  ;;  %7034 = vst [vmem:[#allocation86_spill] sm:$0xff] %v5090_v0  ;;  %v5099_v54 = vmul.f32 %v625_v50, %v6979_v18  ;;  %v5102_v22 = vmul.f32 %v626_v56, %v6981_v60  ;;  %v5105_v7 = vmul.f32 %v627_v2, %v6983_v3 }
  0x7b   : > { %7030 = vst [vmem:[#allocation83_spill] sm:$0xff] %v5081_v13  ;;  %7032 = vst [vmem:[#allocation84_spill] sm:$0xff] %v5084_v14  ;;  %v5108_v39 = vmul.f32 %v628_v35, %v6923_v52  ;;  %v5111_v15 = vmul.f32 %v629_v43, %v6925_v38  ;;  %v5114_v16 = vmul.f32 %v630_v33, %v6927_v61  ;;  %v4123_v13 = vld [vmem:[%s5274_s20 + $0xa8] sm:$0xff] }
  0x7c   : > { %7035 = vst [vmem:[#allocation87_spill] sm:$0xff] %v5093_v24  ;;  %7036 = vst [vmem:[#allocation88_spill] sm:$0xff] %v5096_v23  ;;  %v5117_v17 = vmul.f32 %v631_v53, %v6929_v63  ;;  %v5120_v18 = vmul.f32 %v632_v12, %v6931_v51  ;;  %v5123_v60 = vmul.f32 %v633_v4, %v6933_v44 }
  0x7d   : > { %7037 = vst [vmem:[#allocation89_spill] sm:$0xff] %v5099_v54  ;;  %7038 = vst [vmem:[#allocation90_spill] sm:$0xff] %v5102_v22  ;;  %v5126_v3 = vmul.f32 %v634_v5, %v6935_v42  ;;  %v5129_v52 = vmul.f32 %v619_v57, %v4640_v31  ;;  %v5132_v38 = vmul.f32 %v620_v58, %v4642_v32  ;;  %v7064_v57 = vld [vmem:[#allocation51_spill] sm:$0xff] }
  0x7e   : > { %7039 = vst [vmem:[#allocation4_spill] sm:$0xff] %v5105_v7  ;;  %7040 = vst [vmem:[#allocation91_spill] sm:$0xff] %v5108_v39  ;;  %v5135_v61 = vmul.f32 %v621_v59, %v4644_v62  ;;  %v5138_v63 = vmul.f32 %v622_v20, %v4646_v30  ;;  %v5141_v51 = vmul.f32 %v623_v21, %v4648_v29 }
  0x7f   : > { %7041 = vst [vmem:[#allocation92_spill] sm:$0xff] %v5111_v15  ;;  %7042 = vst [vmem:[#allocation93_spill] sm:$0xff] %v5114_v16  ;;  %v5144_v44 = vmul.f32 %v624_v41, %v4650_v28  ;;  %v5147_v42 = vmul.f32 %v625_v50, %v4652_v25  ;;  %v5150_v31 = vmul.f32 %v626_v56, %v4654_v36  ;;  %v7069_v56 = vld [vmem:[#allocation55_spill] sm:$0xff]  ;;  %v679_v15 = vld [vmem:[%s5274_s20 + $0x60] sm:$0xff] }
  0x80   : > { %7043 = vst [vmem:[#allocation5_spill] sm:$0xff] %v5117_v17  ;;  %7044 = vst [vmem:[#allocation94_spill] sm:$0xff] %v5120_v18  ;;  %v5153_v32 = vmul.f32 %v627_v2, %v4664_v34  ;;  %v5156_v62 = vmul.f32 %v628_v35, %v4666_v1  ;;  %v5159_v30 = vmul.f32 %v629_v43, %v4668_v45  ;;  %v7063_v1 = vld [vmem:[#allocation2_spill] sm:$0xff]  ;;  %v7065_v45 = vld [vmem:[#allocation3_spill] sm:$0xff] }
  0x81   : > { %7045 = vst [vmem:[#allocation6_spill] sm:$0xff] %v5123_v60  ;;  %7046 = vst [vmem:[#allocation95_spill] sm:$0xff] %v5126_v3  ;;  %v5162_v29 = vmul.f32 %v630_v33, %v4670_v46  ;;  %v5165_v28 = vmul.f32 %v631_v53, %v4672_v47  ;;  %v5168_v25 = vmul.f32 %v632_v12, %v4674_v48  ;;  %v7066_v46 = vld [vmem:[#allocation52_spill] sm:$0xff]  ;;  %v7067_v48 = vld [vmem:[#allocation53_spill] sm:$0xff] }
  0x82   : > { %7047 = vst [vmem:[#allocation7_spill] sm:$0xff] %v5129_v52  ;;  %7048 = vst [vmem:[#allocation96_spill] sm:$0xff] %v5132_v38  ;;  %v5171_v36 = vmul.f32 %v633_v4, %v4676_v49  ;;  %v5174_v34 = vmul.f32 %v634_v5, %v4678_v37  ;;  %v702_v58 = vrot.slane %v7064_v57, %v7063_v1  ;;  %v7068_v37 = vld [vmem:[#allocation54_spill] sm:$0xff]  ;;  %v7070_v43 = vld [vmem:[#allocation56_spill] sm:$0xff] }
  0x83   : > { %7049 = vst [vmem:[#allocation8_spill] sm:$0xff] %v5135_v61  ;;  %7050 = vst [vmem:[#allocation97_spill] sm:$0xff] %v5138_v63  ;;  %v706_v59 = vrot.slane %v7064_v57, %v7065_v45  ;;  %v710_v20 = vrot.slane %v7066_v46, %v7063_v1  ;;  %v714_v47 = vrot.slane %v7066_v46, %v7065_v45  ;;  %v7072_v12 = vld [vmem:[#allocation58_spill] sm:$0xff]  ;;  %v7074_v57 = vld [vmem:[#allocation60_spill] sm:$0xff] }
  0x84   : > { %7051 = vst [vmem:[#allocation98_spill] sm:$0xff] %v5141_v51  ;;  %7052 = vst [vmem:[#allocation35_spill] sm:$0xff] %v5144_v44  ;;  %v718_v21 = vrot.slane %v7067_v48, %v7063_v1  ;;  %v722_v49 = vrot.slane %v7067_v48, %v7065_v45  ;;  %v726_v41 = vrot.slane %v7068_v37, %v7063_v1  ;;  %v673_v52 = vld [vmem:[%s5274_s20 + $0x30] sm:$0xff] }
  0x85   : > { %7053 = vst [vmem:[#allocation36_spill] sm:$0xff] %v5147_v42  ;;  %7054 = vst [vmem:[#allocation123_spill] sm:$0xff] %v5150_v31  ;;  %v730_v50 = vrot.slane %v7068_v37, %v7065_v45  ;;  %v734_v2 = vrot.slane %v7069_v56, %v7063_v1  ;;  %v738_v35 = vrot.slane %v7069_v56, %v7065_v45  ;;  %v7075_v37 = vld [vmem:[#allocation61_spill] sm:$0xff] }
  0x86   : > { %7055 = vst [vmem:[#allocation124_spill] sm:$0xff] %v5153_v32  ;;  %7056 = vst [vmem:[#allocation125_spill] sm:$0xff] %v5156_v62  ;;  %v742_v8 = vrot.slane %v7070_v43, %v7063_v1  ;;  %v746_v33 = vrot.slane %v7070_v43, %v7065_v45  ;;  %v750_v53 = vrot.slane %v7071_v9, %v7063_v1 }
  0x87   : > { %7057 = vst [vmem:[#allocation126_spill] sm:$0xff] %v5159_v30  ;;  %7058 = vst [vmem:[#allocation127_spill] sm:$0xff] %v5162_v29  ;;  %v754_v10 = vrot.slane %v7071_v9, %v7065_v45  ;;  %v758_v11 = vrot.slane %v7072_v12, %v7063_v1  ;;  %v762_v4 = vrot.slane %v7072_v12, %v7065_v45  ;;  %v7076_v9 = vld [vmem:[#allocation62_spill] sm:$0xff] }
  0x88   : > { %7059 = vst [vmem:[#allocation128_spill] sm:$0xff] %v5165_v28  ;;  %7060 = vst [vmem:[#allocation129_spill] sm:$0xff] %v5168_v25  ;;  %v766_v5 = vrot.slane %v7073_v27, %v7063_v1  ;;  %v770_v6 = vrot.slane %v7073_v27, %v7065_v45  ;;  %v774_v46 = vrot.slane %v7074_v57, %v7063_v1  ;;  %v7077_v27 = vld [vmem:[#allocation63_spill] sm:$0xff] }
  0x89   : > { %7061 = vst [vmem:[#allocation130_spill] sm:$0xff] %v5171_v36  ;;  %7062 = vst [vmem:[#allocation131_spill] sm:$0xff] %v5174_v34  ;;  %v778_v48 = vrot.slane %v7074_v57, %v7065_v45  ;;  %v782_v56 = vrot.slane %v7075_v37, %v7063_v1  ;;  %v786_v43 = vrot.slane %v7075_v37, %v7065_v45  ;;  %v7078_v57 = vld [vmem:[#allocation64_spill] sm:$0xff]  ;;  %v7079_v37 = vld [vmem:[#allocation65_spill] sm:$0xff] }
  0x8a   : > { %v790_v12 = vrot.slane %v7076_v9, %v7063_v1  ;;  %v794_v34 = vrot.slane %v7076_v9, %v7065_v45  ;;  %v798_v36 = vrot.slane %v7077_v27, %v7063_v1  ;;  %v802_v25 = vrot.slane %v7077_v27, %v7065_v45  ;;  %v7080_v9 = vld [vmem:[#allocation66_spill] sm:$0xff] }
  0x8b   : > { %v806_v28 = vrot.slane %v7078_v57, %v7063_v1  ;;  %v810_v29 = vrot.slane %v7078_v57, %v7065_v45  ;;  %v814_v30 = vrot.slane %v7079_v37, %v7063_v1  ;;  %v818_v62 = vrot.slane %v7079_v37, %v7065_v45 }
  0x8c   : > { %v822_v32 = vrot.slane %v7080_v9, %v7063_v1  ;;  %v826_v31 = vrot.slane %v7080_v9, %v7065_v45  ;;  %v5241_v27 = vrot.slane %v702_v58, %v7063_v1  ;;  %v5244_v42 = vrot.slane %v706_v59, %v7063_v1 }
  0x8d   : > { %v5247_v57 = vrot.slane %v710_v20, %v7063_v1  ;;  %v5250_v44 = vrot.slane %v714_v47, %v7063_v1  ;;  %v5254_v37 = vrot.slane %v718_v21, %v7063_v1  ;;  %v5257_v51 = vrot.slane %v722_v49, %v7063_v1 }
  0x8e   : > { %v5260_v9 = vrot.slane %v726_v41, %v7063_v1  ;;  %v890_v58 = vrot.slane %v730_v50, %v7063_v1  ;;  %v894_v59 = vrot.slane %v734_v2, %v7063_v1  ;;  %v898_v20 = vrot.slane %v738_v35, %v7063_v1 }
  0x8f   : > { %v902_v63 = vrot.slane %v742_v8, %v7063_v1  ;;  %v906_v47 = vrot.slane %v746_v33, %v7063_v1  ;;  %v910_v61 = vrot.slane %v750_v53, %v7063_v1  ;;  %v914_v21 = vrot.slane %v754_v10, %v7063_v1 }
  0x90   : > { %v918_v49 = vrot.slane %v758_v11, %v7063_v1  ;;  %v922_v38 = vrot.slane %v762_v4, %v7063_v1  ;;  %v926_v41 = vrot.slane %v766_v5, %v7063_v1  ;;  %v930_v50 = vrot.slane %v770_v6, %v7063_v1 }
  0x91   : > { %v934_v2 = vrot.slane %v774_v46, %v7063_v1  ;;  %v938_v35 = vrot.slane %v778_v48, %v7063_v1  ;;  %v942_v8 = vrot.slane %v782_v56, %v7063_v1  ;;  %v946_v33 = vrot.slane %v786_v43, %v7063_v1  ;;  %v667_v46 = vld [vmem:[%s5274_s20] sm:$0xff] }
  0x92   : > { %v950_v53 = vrot.slane %v790_v12, %v7063_v1  ;;  %v954_v10 = vrot.slane %v794_v34, %v7063_v1  ;;  %v958_v11 = vrot.slane %v798_v36, %v7063_v1  ;;  %v962_v4 = vrot.slane %v802_v25, %v7063_v1  ;;  %v668_v36 = vld [vmem:[%s5274_s20 + $0x8] sm:$0xff]  ;;  %v669_v25 = vld [vmem:[%s5274_s20 + $0x10] sm:$0xff]  ;;  %v670_v12 = vld [vmem:[%s5274_s20 + $0x18] sm:$0xff] }
  0x93   : > { %v966_v5 = vrot.slane %v806_v28, %v7063_v1  ;;  %v970_v6 = vrot.slane %v810_v29, %v7063_v1  ;;  %v974_v48 = vrot.slane %v814_v30, %v7063_v1  ;;  %v978_v56 = vrot.slane %v818_v62, %v7063_v1  ;;  %v671_v62 = vld [vmem:[%s5274_s20 + $0x20] sm:$0xff] }
  0x94   : > { %v982_v43 = vrot.slane %v822_v32, %v7063_v1  ;;  %v986_v34 = vrot.slane %v826_v31, %v7063_v1  ;;  %v1019_v28 = vcombine.low %v5241_v27, %v5244_v42  ;;  %v1020_v29 = vcombine.low %v5247_v57, %v5250_v44  ;;  %v672_v31 = vld [vmem:[%s5274_s20 + $0x28] sm:$0xff]  ;;  %v674_v42 = vld [vmem:[%s5274_s20 + $0x38] sm:$0xff]  ;;  %v675_v44 = vld [vmem:[%s5274_s20 + $0x40] sm:$0xff] }
  0x95   : > { %v1021_v30 = vcombine.low %v5254_v37, %v5257_v51  ;;  %v1022_v32 = vcombine.low %v5260_v9, %v890_v58  ;;  %v1023_v3 = vcombine.low %v894_v59, %v898_v20  ;;  %v1024_v60 = vcombine.low %v902_v63, %v906_v47  ;;  %v676_v27 = vld [vmem:[%s5274_s20 + $0x48] sm:$0xff]  ;;  %v677_v9 = vld [vmem:[%s5274_s20 + $0x50] sm:$0xff]  ;;  %v678_v58 = vld [vmem:[%s5274_s20 + $0x58] sm:$0xff] }
  0x96   : > { %v1025_v18 = vcombine.low %v910_v61, %v914_v21  ;;  %v1026_v17 = vcombine.low %v918_v49, %v922_v38  ;;  %v1027_v57 = vcombine.low %v926_v41, %v930_v50  ;;  %v1028_v51 = vcombine.low %v934_v2, %v938_v35  ;;  %v680_v63 = vld [vmem:[%s5274_s20 + $0x68] sm:$0xff]  ;;  %v681_v61 = vld [vmem:[%s5274_s20 + $0x70] sm:$0xff]  ;;  %v682_v20 = vld [vmem:[%s5274_s20 + $0x78] sm:$0xff] }
  0x97   : > { %v1029_v37 = vcombine.low %v942_v8, %v946_v33  ;;  %v1030_v16 = vcombine.low %v950_v53, %v954_v10  ;;  %v1031_v39 = vcombine.low %v958_v11, %v962_v4  ;;  %v1032_v7 = vcombine.low %v966_v5, %v970_v6  ;;  %v7088_v5 = vld [vmem:[#allocation68_spill] sm:$0xff] }
  0x98   : > { %v1033_v22 = vcombine.low %v974_v48, %v978_v56  ;;  %v1034_v59 = vcombine.low %v982_v43, %v986_v34  ;;  %v5315_v38 = vmul.f32 %v1019_v28, %v667_v46  ;;  %v5317_v47 = vmul.f32 %v1020_v29, %v668_v36  ;;  %v7091_v56 = vld [vmem:[#allocation71_spill] sm:$0xff]  ;;  %v7092_v36 = vld [vmem:[#allocation72_spill] sm:$0xff]  ;;  %v7093_v28 = vld [vmem:[#allocation73_spill] sm:$0xff] }
  0x99   : > { %v5319_v21 = vmul.f32 %v1021_v30, %v669_v25  ;;  %v5321_v49 = vmul.f32 %v1022_v32, %v670_v12  ;;  %v5323_v41 = vmul.f32 %v1023_v3, %v671_v62  ;;  %v5325_v50 = vmul.f32 %v1024_v60, %v672_v31  ;;  %v7094_v32 = vld [vmem:[#allocation74_spill] sm:$0xff] }
  0x9a   : > { %v5327_v2 = vmul.f32 %v1025_v18, %v673_v52  ;;  %v5329_v35 = vmul.f32 %v1026_v17, %v674_v42  ;;  %v5331_v8 = vmul.f32 %v1027_v57, %v675_v44  ;;  %v5333_v33 = vmul.f32 %v1028_v51, %v676_v27  ;;  %v7087_v18 = vld [vmem:[#allocation67_spill] sm:$0xff]  ;;  %v7096_v57 = vld [vmem:[#allocation76_spill] sm:$0xff] }
  0x9b   : > { %v5335_v53 = vmul.f32 %v1029_v37, %v677_v9  ;;  %v5337_v10 = vmul.f32 %v1030_v16, %v678_v58  ;;  %v5339_v11 = vmul.f32 %v1031_v39, %v679_v15  ;;  %v5341_v4 = vmul.f32 %v1032_v7, %v680_v63  ;;  %v7089_v39 = vld [vmem:[#allocation69_spill] sm:$0xff]  ;;  %v7090_v15 = vld [vmem:[#allocation70_spill] sm:$0xff]  ;;  %v7095_v42 = vld [vmem:[#allocation75_spill] sm:$0xff] }
  0x9c   : > { %v5343_v3 = vmul.f32 %v1033_v22, %v681_v61  ;;  %v5345_v60 = vmul.f32 %v1034_v59, %v682_v20  ;;  %v1103_v17 = vrot.slane %v7087_v18, %v7063_v1  ;;  %v1107_v52 = vrot.slane %v7087_v18, %v7065_v45  ;;  %v7097_v9 = vld [vmem:[#allocation77_spill] sm:$0xff]  ;;  %v7098_v63 = vld [vmem:[#allocation78_spill] sm:$0xff]  ;;  %v7099_v18 = vld [vmem:[#allocation79_spill] sm:$0xff] }
  0x9d   : > { %7081 = vst [vmem:[#allocation51_spill] sm:$0xff] %v5335_v53  ;;  %7082 = vst [vmem:[#allocation52_spill] sm:$0xff] %v5337_v10  ;;  %v1111_v6 = vrot.slane %v7088_v5, %v7063_v1  ;;  %v1115_v16 = vrot.slane %v7088_v5, %v7065_v45  ;;  %v1119_v7 = vrot.slane %v7089_v39, %v7063_v1 }
  0x9e   : > { %7083 = vst [vmem:[#allocation53_spill] sm:$0xff] %v5339_v11  ;;  %7084 = vst [vmem:[#allocation54_spill] sm:$0xff] %v5341_v4  ;;  %v1123_v22 = vrot.slane %v7089_v39, %v7065_v45  ;;  %v1127_v46 = vrot.slane %v7090_v15, %v7063_v1  ;;  %v1131_v48 = vrot.slane %v7090_v15, %v7065_v45  ;;  %v7100_v15 = vld [vmem:[#allocation80_spill] sm:$0xff] }
  0x9f   : > { %7085 = vst [vmem:[#allocation55_spill] sm:$0xff] %v5343_v3  ;;  %7086 = vst [vmem:[#allocation56_spill] sm:$0xff] %v5345_v60  ;;  %v1135_v43 = vrot.slane %v7091_v56, %v7063_v1  ;;  %v1139_v34 = vrot.slane %v7091_v56, %v7065_v45  ;;  %v1143_v25 = vrot.slane %v7092_v36, %v7063_v1  ;;  %v4130_v60 = vld [vmem:[%s5274_s20 + $0xe0] sm:$0xff] }
  0xa0   : > { %v1147_v12 = vrot.slane %v7092_v36, %v7065_v45  ;;  %v1151_v29 = vrot.slane %v7093_v28, %v7063_v1  ;;  %v1155_v30 = vrot.slane %v7093_v28, %v7065_v45  ;;  %v1159_v62 = vrot.slane %v7094_v32, %v7063_v1  ;;  %v7101_v28 = vld [vmem:[#allocation81_spill] sm:$0xff] }
  0xa1   : > { %v1163_v31 = vrot.slane %v7094_v32, %v7065_v45  ;;  %v1167_v44 = vrot.slane %v7095_v42, %v7063_v1  ;;  %v1171_v27 = vrot.slane %v7095_v42, %v7065_v45  ;;  %v1175_v51 = vrot.slane %v7096_v57, %v7063_v1 }
  0xa2   : > { %v1179_v37 = vrot.slane %v7096_v57, %v7065_v45  ;;  %v1183_v58 = vrot.slane %v7097_v9, %v7063_v1  ;;  %v1187_v59 = vrot.slane %v7097_v9, %v7065_v45  ;;  %v1191_v61 = vrot.slane %v7098_v63, %v7063_v1  ;;  %v7102_v57 = vld [vmem:[#allocation82_spill] sm:$0xff] }
  0xa3   : > { %v1195_v20 = vrot.slane %v7098_v63, %v7065_v45  ;;  %v1199_v5 = vrot.slane %v7099_v18, %v7063_v1  ;;  %v1203_v39 = vrot.slane %v7099_v18, %v7065_v45  ;;  %v1207_v56 = vrot.slane %v7100_v15, %v7063_v1 }
  0xa4   : > { %v1211_v36 = vrot.slane %v7100_v15, %v7065_v45  ;;  %v1215_v32 = vrot.slane %v7101_v28, %v7063_v1  ;;  %v1219_v42 = vrot.slane %v7101_v28, %v7065_v45  ;;  %v1223_v9 = vrot.slane %v7102_v57, %v7063_v1 }
  0xa5   : > { %v1227_v63 = vrot.slane %v7102_v57, %v7065_v45  ;;  %v5412_v18 = vrot.slane %v1103_v17, %v7063_v1  ;;  %v5415_v54 = vrot.slane %v1107_v52, %v7063_v1  ;;  %v5418_v15 = vrot.slane %v1111_v6, %v7063_v1 }
  0xa6   : > { %v5421_v23 = vrot.slane %v1115_v16, %v7063_v1  ;;  %v5424_v28 = vrot.slane %v1119_v7, %v7063_v1  ;;  %v1283_v24 = vrot.slane %v1123_v22, %v7063_v1  ;;  %v1287_v0 = vrot.slane %v1127_v46, %v7063_v1 }
  0xa7   : > { %v1291_v57 = vrot.slane %v1131_v48, %v7063_v1  ;;  %v1295_v17 = vrot.slane %v1135_v43, %v7063_v1  ;;  %v1299_v52 = vrot.slane %v1139_v34, %v7063_v1  ;;  %v1303_v40 = vrot.slane %v1143_v25, %v7063_v1 }
  0xa8   : > { %v1307_v6 = vrot.slane %v1147_v12, %v7063_v1  ;;  %v1311_v16 = vrot.slane %v1151_v29, %v7063_v1  ;;  %v1315_v7 = vrot.slane %v1155_v30, %v7063_v1  ;;  %v1319_v14 = vrot.slane %v1159_v62, %v7063_v1 }
  0xa9   : > { %v1323_v22 = vrot.slane %v1163_v31, %v7063_v1  ;;  %v1327_v46 = vrot.slane %v1167_v44, %v7063_v1  ;;  %v1331_v48 = vrot.slane %v1171_v27, %v7063_v1  ;;  %v1335_v43 = vrot.slane %v1175_v51, %v7063_v1  ;;  %v4118_v51 = vld [vmem:[%s5274_s20 + $0x80] sm:$0xff] }
  0xaa   : > { %v1339_v34 = vrot.slane %v1179_v37, %v7063_v1  ;;  %v1343_v25 = vrot.slane %v1183_v58, %v7063_v1  ;;  %v1347_v12 = vrot.slane %v1187_v59, %v7063_v1  ;;  %v1351_v29 = vrot.slane %v1191_v61, %v7063_v1 }
  0xab   : > { %v1355_v30 = vrot.slane %v1195_v20, %v7063_v1  ;;  %v1359_v62 = vrot.slane %v1199_v5, %v7063_v1  ;;  %v1363_v31 = vrot.slane %v1203_v39, %v7063_v1  ;;  %v1367_v44 = vrot.slane %v1207_v56, %v7063_v1  ;;  %v4119_v20 = vld [vmem:[%s5274_s20 + $0x88] sm:$0xff]  ;;  %v4120_v5 = vld [vmem:[%s5274_s20 + $0x90] sm:$0xff]  ;;  %v4121_v39 = vld [vmem:[%s5274_s20 + $0x98] sm:$0xff] }
  0xac   : > { %v1371_v27 = vrot.slane %v1211_v36, %v7063_v1  ;;  %v1375_v37 = vrot.slane %v1215_v32, %v7063_v1  ;;  %v1379_v58 = vrot.slane %v1219_v42, %v7063_v1  ;;  %v1383_v59 = vrot.slane %v1223_v9, %v7063_v1  ;;  %v4122_v9 = vld [vmem:[%s5274_s20 + $0xa0] sm:$0xff] }
  0xad   : > { %v1387_v61 = vrot.slane %v1227_v63, %v7063_v1  ;;  %v1420_v56 = vcombine.low %v5412_v18, %v5415_v54  ;;  %v1421_v36 = vcombine.low %v5418_v15, %v5421_v23  ;;  %v1422_v32 = vcombine.low %v5424_v28, %v1283_v24  ;;  %v4124_v63 = vld [vmem:[%s5274_s20 + $0xb0] sm:$0xff]  ;;  %v4125_v1 = vld [vmem:[%s5274_s20 + $0xb8] sm:$0xff]  ;;  %v4126_v54 = vld [vmem:[%s5274_s20 + $0xc0] sm:$0xff] }
  0xae   : > { %v1423_v42 = vcombine.low %v1287_v0, %v1291_v57  ;;  %v1424_v55 = vcombine.low %v1295_v17, %v1299_v52  ;;  %v1425_v19 = vcombine.low %v1303_v40, %v1307_v6  ;;  %v1426_v26 = vcombine.low %v1311_v16, %v1315_v7  ;;  %v4127_v18 = vld [vmem:[%s5274_s20 + $0xc8] sm:$0xff]  ;;  %v4128_v0 = vld [vmem:[%s5274_s20 + $0xd0] sm:$0xff]  ;;  %v4129_v57 = vld [vmem:[%s5274_s20 + $0xd8] sm:$0xff] }
  0xaf   : > { %v1427_v45 = vcombine.low %v1319_v14, %v1323_v22  ;;  %v1428_v23 = vcombine.low %v1327_v46, %v1331_v48  ;;  %v1429_v15 = vcombine.low %v1335_v43, %v1339_v34  ;;  %v1430_v24 = vcombine.low %v1343_v25, %v1347_v12  ;;  %v4131_v40 = vld [vmem:[%s5274_s20 + $0xe8] sm:$0xff]  ;;  %v4132_v52 = vld [vmem:[%s5274_s20 + $0xf0] sm:$0xff]  ;;  %v4133_v6 = vld [vmem:[%s5274_s20 + $0xf8] sm:$0xff] }
  0xb0   : > { %v1431_v28 = vcombine.low %v1351_v29, %v1355_v30  ;;  %v1432_v3 = vcombine.low %v1359_v62, %v1363_v31  ;;  %v1433_v4 = vcombine.low %v1367_v44, %v1371_v27  ;;  %v1434_v11 = vcombine.low %v1375_v37, %v1379_v58  ;;  %v7117_v37 = vld [vmem:[#allocation3_spill] sm:$0xff] }
  0xb1   : > { %v1435_v17 = vcombine.low %v1383_v59, %v1387_v61  ;;  %v1452_v14 = vmul.f32 %v4118_v51, %v1420_v56  ;;  %v1453_v16 = vmul.f32 %v4119_v20, %v1421_v36  ;;  %v1454_v7 = vmul.f32 %v4120_v5, %v1422_v32  ;;  %v7118_v59 = vld [vmem:[#allocation11_spill] sm:$0xff]  ;;  %v7119_v5 = vld [vmem:[#allocation12_spill] sm:$0xff]  ;;  %v7120_v36 = vld [vmem:[#allocation13_spill] sm:$0xff] }
  0xb2   : > { %v1455_v22 = vmul.f32 %v4121_v39, %v1423_v42  ;;  %v1456_v10 = vmul.f32 %v4122_v9, %v1424_v55  ;;  %v1457_v53 = vmul.f32 %v4123_v13, %v1425_v19  ;;  %v1458_v46 = vmul.f32 %v4124_v63, %v1426_v26  ;;  %v7121_v9 = vld [vmem:[#allocation14_spill] sm:$0xff] }
  0xb3   : > { %v1459_v48 = vmul.f32 %v4125_v1, %v1427_v45  ;;  %v1460_v43 = vmul.f32 %v4126_v54, %v1428_v23  ;;  %v1461_v34 = vmul.f32 %v4127_v18, %v1429_v15  ;;  %v1462_v25 = vmul.f32 %v4128_v0, %v1430_v24  ;;  %v7122_v18 = vld [vmem:[#allocation15_spill] sm:$0xff]  ;;  %v7123_v24 = vld [vmem:[#allocation16_spill] sm:$0xff] }
  0xb4   : > { %v1463_v12 = vmul.f32 %v4129_v57, %v1431_v28  ;;  %v1464_v29 = vmul.f32 %v4130_v60, %v1432_v3  ;;  %v1465_v30 = vmul.f32 %v4131_v40, %v1433_v4  ;;  %v1466_v62 = vmul.f32 %v4132_v52, %v1434_v11  ;;  %v7116_v3 = vld [vmem:[#allocation10_spill] sm:$0xff]  ;;  %v7124_v57 = vld [vmem:[#allocation17_spill] sm:$0xff] }
  0xb5   : > { %v1467_v31 = vmul.f32 %v4133_v6, %v1435_v17  ;;  %v5475_v44 = vadd.f32 %v1452_v14, %v5315_v38  ;;  %v5478_v27 = vadd.f32 %v1453_v16, %v5317_v47  ;;  %v5481_v51 = vadd.f32 %v1454_v7, %v5319_v21  ;;  %v7103_v47 = vld [vmem:[#allocation51_spill] sm:$0xff]  ;;  %v7125_v52 = vld [vmem:[#allocation18_spill] sm:$0xff]  ;;  %v7126_v16 = vld [vmem:[#allocation37_spill] sm:$0xff] }
  0xb6   : > { %v5484_v26 = vadd.f32 %v1455_v22, %v5321_v49  ;;  %v5487_v19 = vadd.f32 %v1456_v10, %v5323_v41  ;;  %v5490_v55 = vadd.f32 %v1457_v53, %v5325_v50  ;;  %v5493_v13 = vadd.f32 %v1458_v46, %v5327_v2  ;;  %v7105_v49 = vld [vmem:[#allocation52_spill] sm:$0xff]  ;;  %v7107_v50 = vld [vmem:[#allocation53_spill] sm:$0xff]  ;;  %v7109_v2 = vld [vmem:[#allocation54_spill] sm:$0xff] }
  0xb7   : > { %v5496_v1 = vadd.f32 %v1459_v48, %v5329_v35  ;;  %v5499_v45 = vadd.f32 %v1460_v43, %v5331_v8  ;;  %v5502_v38 = vadd.f32 %v1461_v34, %v5333_v33  ;;  %v5505_v21 = vadd.f32 %v1462_v25, %v7103_v47  ;;  %v7111_v35 = vld [vmem:[#allocation55_spill] sm:$0xff]  ;;  %v7113_v8 = vld [vmem:[#allocation56_spill] sm:$0xff]  ;;  %v7115_v33 = vld [vmem:[#allocation2_spill] sm:$0xff] }
  0xb8   : > { %v5508_v41 = vadd.f32 %v1463_v12, %v7105_v49  ;;  %v5511_v53 = vadd.f32 %v1464_v29, %v7107_v50  ;;  %v5514_v10 = vadd.f32 %v1465_v30, %v7109_v2  ;;  %v5517_v11 = vadd.f32 %v1466_v62, %v7111_v35  ;;  %v7127_v46 = vld [vmem:[#allocation44_spill] sm:$0xff]  ;;  %v7128_v34 = vld [vmem:[#allocation45_spill] sm:$0xff]  ;;  %v7129_v29 = vld [vmem:[#allocation46_spill] sm:$0xff] }
  0xb9   : > { %7104 = vst [vmem:[#allocation57_spill] sm:$0xff] %v5505_v21  ;;  %v5520_v4 = vadd.f32 %v1467_v31, %v7113_v8  ;;  %v1520_v60 = vrot.slane %v7116_v3, %v7115_v33  ;;  %v1524_v58 = vrot.slane %v7116_v3, %v7117_v37  ;;  %v1528_v61 = vrot.slane %v7118_v59, %v7115_v33  ;;  %v7130_v31 = vld [vmem:[#allocation47_spill] sm:$0xff]  ;;  %v7131_v50 = vld [vmem:[#allocation48_spill] sm:$0xff]  ;;  %v7132_v8 = vld [vmem:[#allocation49_spill] sm:$0xff] }
  0xba   : > { %7106 = vst [vmem:[#allocation58_spill] sm:$0xff] %v5508_v41  ;;  %7108 = vst [vmem:[#allocation59_spill] sm:$0xff] %v5511_v53  ;;  %v1532_v20 = vrot.slane %v7118_v59, %v7117_v37  ;;  %v1536_v39 = vrot.slane %v7119_v5, %v7115_v33  ;;  %v1540_v56 = vrot.slane %v7119_v5, %v7117_v37 }
  0xbb   : > { %7110 = vst [vmem:[#allocation60_spill] sm:$0xff] %v5514_v10  ;;  %7112 = vst [vmem:[#allocation61_spill] sm:$0xff] %v5517_v11  ;;  %v1544_v32 = vrot.slane %v7120_v36, %v7115_v33  ;;  %v1548_v42 = vrot.slane %v7120_v36, %v7117_v37  ;;  %v1552_v63 = vrot.slane %v7121_v9, %v7115_v33 }
  0xbc   : > { %7114 = vst [vmem:[#allocation62_spill] sm:$0xff] %v5520_v4  ;;  %v1556_v54 = vrot.slane %v7121_v9, %v7117_v37  ;;  %v1560_v23 = vrot.slane %v7122_v18, %v7115_v33  ;;  %v1564_v15 = vrot.slane %v7122_v18, %v7117_v37  ;;  %v1568_v28 = vrot.slane %v7123_v24, %v7115_v33  ;;  %v4146_v4 = vld [vmem:[%s5274_s20 + $0x160] sm:$0xff] }
  0xbd   : > { %v1572_v0 = vrot.slane %v7123_v24, %v7117_v37  ;;  %v1576_v17 = vrot.slane %v7124_v57, %v7115_v33  ;;  %v1580_v40 = vrot.slane %v7124_v57, %v7117_v37  ;;  %v1584_v6 = vrot.slane %v7125_v52, %v7115_v33 }
  0xbe   : > { %v1588_v14 = vrot.slane %v7125_v52, %v7117_v37  ;;  %v1592_v7 = vrot.slane %v7126_v16, %v7115_v33  ;;  %v1596_v22 = vrot.slane %v7126_v16, %v7117_v37  ;;  %v1600_v48 = vrot.slane %v7127_v46, %v7115_v33 }
  0xbf   : > { %v1604_v43 = vrot.slane %v7127_v46, %v7117_v37  ;;  %v1608_v25 = vrot.slane %v7128_v34, %v7115_v33  ;;  %v1612_v12 = vrot.slane %v7128_v34, %v7117_v37  ;;  %v1616_v30 = vrot.slane %v7129_v29, %v7115_v33 }
  0xc0   : > { %v1620_v62 = vrot.slane %v7129_v29, %v7117_v37  ;;  %v1624_v47 = vrot.slane %v7130_v31, %v7115_v33  ;;  %v1628_v49 = vrot.slane %v7130_v31, %v7117_v37  ;;  %v1632_v2 = vrot.slane %v7131_v50, %v7115_v33  ;;  %v4136_v29 = vld [vmem:[%s5274_s20 + $0x110] sm:$0xff] }
  0xc1   : > { %v1636_v35 = vrot.slane %v7131_v50, %v7117_v37  ;;  %v1640_v3 = vrot.slane %v7132_v8, %v7115_v33  ;;  %v1644_v59 = vrot.slane %v7132_v8, %v7117_v37  ;;  %v5587_v5 = vrot.slane %v1520_v60, %v7115_v33  ;;  %v4138_v50 = vld [vmem:[%s5274_s20 + $0x120] sm:$0xff] }
  0xc2   : > { %v5590_v36 = vrot.slane %v1524_v58, %v7115_v33  ;;  %v5593_v9 = vrot.slane %v1528_v61, %v7115_v33  ;;  %v5596_v18 = vrot.slane %v1532_v20, %v7115_v33  ;;  %v5599_v24 = vrot.slane %v1536_v39, %v7115_v33 }
  0xc3   : > { %v1700_v57 = vrot.slane %v1540_v56, %v7115_v33  ;;  %v1704_v52 = vrot.slane %v1544_v32, %v7115_v33  ;;  %v1708_v16 = vrot.slane %v1548_v42, %v7115_v33  ;;  %v1712_v60 = vrot.slane %v1552_v63, %v7115_v33 }
  0xc4   : > { %v1716_v58 = vrot.slane %v1556_v54, %v7115_v33  ;;  %v1720_v46 = vrot.slane %v1560_v23, %v7115_v33  ;;  %v1724_v61 = vrot.slane %v1564_v15, %v7115_v33  ;;  %v1728_v20 = vrot.slane %v1568_v28, %v7115_v33 }
  0xc5   : > { %v1732_v39 = vrot.slane %v1572_v0, %v7115_v33  ;;  %v1736_v34 = vrot.slane %v1576_v17, %v7115_v33  ;;  %v1740_v56 = vrot.slane %v1580_v40, %v7115_v33  ;;  %v1744_v32 = vrot.slane %v1584_v6, %v7115_v33 }
  0xc6   : > { %v1748_v42 = vrot.slane %v1588_v14, %v7115_v33  ;;  %v1752_v63 = vrot.slane %v1592_v7, %v7115_v33  ;;  %v1756_v54 = vrot.slane %v1596_v22, %v7115_v33  ;;  %v1760_v23 = vrot.slane %v1600_v48, %v7115_v33  ;;  %v4134_v7 = vld [vmem:[%s5274_s20 + $0x100] sm:$0xff] }
  0xc7   : > { %v1764_v15 = vrot.slane %v1604_v43, %v7115_v33  ;;  %v1768_v28 = vrot.slane %v1608_v25, %v7115_v33  ;;  %v1772_v0 = vrot.slane %v1612_v12, %v7115_v33  ;;  %v1776_v17 = vrot.slane %v1616_v30, %v7115_v33  ;;  %v4135_v12 = vld [vmem:[%s5274_s20 + $0x108] sm:$0xff]  ;;  %v4137_v30 = vld [vmem:[%s5274_s20 + $0x118] sm:$0xff] }
  0xc8   : > { %v1780_v40 = vrot.slane %v1620_v62, %v7115_v33  ;;  %v1784_v6 = vrot.slane %v1624_v47, %v7115_v33  ;;  %v1788_v14 = vrot.slane %v1628_v49, %v7115_v33  ;;  %v1792_v22 = vrot.slane %v1632_v2, %v7115_v33  ;;  %v4139_v2 = vld [vmem:[%s5274_s20 + $0x128] sm:$0xff] }
  0xc9   : > { %v1796_v48 = vrot.slane %v1636_v35, %v7115_v33  ;;  %v1800_v43 = vrot.slane %v1640_v3, %v7115_v33  ;;  %v1804_v25 = vrot.slane %v1644_v59, %v7115_v33  ;;  %v1837_v62 = vcombine.low %v5587_v5, %v5590_v36  ;;  %v4140_v35 = vld [vmem:[%s5274_s20 + $0x130] sm:$0xff]  ;;  %v4141_v33 = vld [vmem:[%s5274_s20 + $0x138] sm:$0xff]  ;;  %v4142_v5 = vld [vmem:[%s5274_s20 + $0x140] sm:$0xff] }
  0xca   : > { %v1838_v31 = vcombine.low %v5593_v9, %v5596_v18  ;;  %v1839_v47 = vcombine.low %v5599_v24, %v1700_v57  ;;  %v1840_v49 = vcombine.low %v1704_v52, %v1708_v16  ;;  %v1841_v8 = vcombine.low %v1712_v60, %v1716_v58  ;;  %v4143_v36 = vld [vmem:[%s5274_s20 + $0x148] sm:$0xff]  ;;  %v4144_v52 = vld [vmem:[%s5274_s20 + $0x150] sm:$0xff]  ;;  %v4145_v16 = vld [vmem:[%s5274_s20 + $0x158] sm:$0xff] }
  0xcb   : > { %v1842_v3 = vcombine.low %v1720_v46, %v1724_v61  ;;  %v1843_v59 = vcombine.low %v1728_v20, %v1732_v39  ;;  %v1844_v37 = vcombine.low %v1736_v34, %v1740_v56  ;;  %v1845_v9 = vcombine.low %v1744_v32, %v1748_v42  ;;  %v4147_v58 = vld [vmem:[%s5274_s20 + $0x168] sm:$0xff]  ;;  %v4148_v46 = vld [vmem:[%s5274_s20 + $0x170] sm:$0xff]  ;;  %v4149_v61 = vld [vmem:[%s5274_s20 + $0x178] sm:$0xff] }
  0xcc   : > { %v1846_v18 = vcombine.low %v1752_v63, %v1756_v54  ;;  %v1847_v24 = vcombine.low %v1760_v23, %v1764_v15  ;;  %v1848_v57 = vcombine.low %v1768_v28, %v1772_v0  ;;  %v1849_v11 = vcombine.low %v1776_v17, %v1780_v40 }
  0xcd   : > { %v1850_v10 = vcombine.low %v1784_v6, %v1788_v14  ;;  %v1851_v53 = vcombine.low %v1792_v22, %v1796_v48  ;;  %v1852_v60 = vcombine.low %v1800_v43, %v1804_v25  ;;  %v1869_v20 = vmul.f32 %v4134_v7, %v1837_v62  ;;  %v7146_v43 = vld [vmem:[#allocation50_spill] sm:$0xff] }
  0xce   : > { %v1870_v39 = vmul.f32 %v4135_v12, %v1838_v31  ;;  %v1871_v34 = vmul.f32 %v4136_v29, %v1839_v47  ;;  %v1872_v56 = vmul.f32 %v4137_v30, %v1840_v49  ;;  %v1873_v41 = vmul.f32 %v4138_v50, %v1841_v8  ;;  %v7147_v12 = vld [vmem:[#allocation3_spill] sm:$0xff]  ;;  %v7149_v47 = vld [vmem:[#allocation100_spill] sm:$0xff] }
  0xcf   : > { %v1874_v21 = vmul.f32 %v4139_v2, %v1842_v3  ;;  %v1875_v32 = vmul.f32 %v4140_v35, %v1843_v59  ;;  %v1876_v42 = vmul.f32 %v4141_v33, %v1844_v37  ;;  %v1877_v63 = vmul.f32 %v4142_v5, %v1845_v9  ;;  %v7148_v30 = vld [vmem:[#allocation99_spill] sm:$0xff]  ;;  %v7150_v2 = vld [vmem:[#allocation101_spill] sm:$0xff]  ;;  %v7151_v3 = vld [vmem:[#allocation102_spill] sm:$0xff] }
  0xd0   : > { %v1878_v54 = vmul.f32 %v4143_v36, %v1846_v18  ;;  %v1879_v23 = vmul.f32 %v4144_v52, %v1847_v24  ;;  %v1880_v15 = vmul.f32 %v4145_v16, %v1848_v57  ;;  %v1881_v28 = vmul.f32 %v4146_v4, %v1849_v11  ;;  %v7152_v36 = vld [vmem:[#allocation103_spill] sm:$0xff]  ;;  %v7153_v24 = vld [vmem:[#allocation104_spill] sm:$0xff]  ;;  %v7154_v16 = vld [vmem:[#allocation105_spill] sm:$0xff] }
  0xd1   : > { %v1882_v0 = vmul.f32 %v4147_v58, %v1850_v10  ;;  %v1883_v17 = vmul.f32 %v4148_v46, %v1851_v53  ;;  %v1884_v40 = vmul.f32 %v4149_v61, %v1852_v60  ;;  %v5650_v6 = vadd.f32 %v1869_v20, %v5475_v44  ;;  %v7155_v46 = vld [vmem:[#allocation106_spill] sm:$0xff] }
  0xd2   : > { %v5653_v14 = vadd.f32 %v1870_v39, %v5478_v27  ;;  %v5656_v7 = vadd.f32 %v1871_v34, %v5481_v51  ;;  %v5659_v22 = vadd.f32 %v1872_v56, %v5484_v26  ;;  %v5662_v33 = vadd.f32 %v1873_v41, %v5487_v19  ;;  %v7133_v26 = vld [vmem:[#allocation57_spill] sm:$0xff]  ;;  %v7135_v19 = vld [vmem:[#allocation58_spill] sm:$0xff]  ;;  %v7156_v39 = vld [vmem:[#allocation107_spill] sm:$0xff] }
  0xd3   : > { %v5665_v11 = vadd.f32 %v1874_v21, %v5490_v55  ;;  %v5668_v53 = vadd.f32 %v1875_v32, %v5493_v13  ;;  %v5671_v44 = vadd.f32 %v1876_v42, %v5496_v1  ;;  %v5674_v27 = vadd.f32 %v1877_v63, %v5499_v45  ;;  %v7137_v55 = vld [vmem:[#allocation59_spill] sm:$0xff]  ;;  %v7139_v13 = vld [vmem:[#allocation60_spill] sm:$0xff]  ;;  %v7141_v1 = vld [vmem:[#allocation61_spill] sm:$0xff] }
  0xd4   : > { %v5677_v51 = vadd.f32 %v1878_v54, %v5502_v38  ;;  %v5680_v10 = vadd.f32 %v1879_v23, %v7133_v26  ;;  %v5683_v41 = vadd.f32 %v1880_v15, %v7135_v19  ;;  %v5686_v21 = vadd.f32 %v1881_v28, %v7137_v55  ;;  %v7143_v45 = vld [vmem:[#allocation62_spill] sm:$0xff]  ;;  %v7157_v32 = vld [vmem:[#allocation108_spill] sm:$0xff]  ;;  %v7158_v54 = vld [vmem:[#allocation109_spill] sm:$0xff] }
  0xd5   : > { %v5689_v4 = vadd.f32 %v1882_v0, %v7139_v13  ;;  %v5692_v37 = vadd.f32 %v1883_v17, %v7141_v1  ;;  %v5695_v48 = vadd.f32 %v1884_v40, %v7143_v45  ;;  %v7145_v38 = vld [vmem:[#allocation2_spill] sm:$0xff]  ;;  %v1941_v29 = vrot.slane %v7146_v43, %v7147_v12  ;;  %v7160_v40 = vld [vmem:[#allocation111_spill] sm:$0xff]  ;;  %v7161_v55 = vld [vmem:[#allocation112_spill] sm:$0xff] }
  0xd6   : > { %7134 = vst [vmem:[#allocation63_spill] sm:$0xff] %v5680_v10  ;;  %7136 = vst [vmem:[#allocation64_spill] sm:$0xff] %v5683_v41  ;;  %v1937_v25 = vrot.slane %v7146_v43, %v7145_v38  ;;  %v1945_v62 = vrot.slane %v7148_v30, %v7145_v38  ;;  %v1949_v31 = vrot.slane %v7148_v30, %v7147_v12  ;;  %v7159_v28 = vld [vmem:[#allocation110_spill] sm:$0xff]  ;;  %v7162_v45 = vld [vmem:[#allocation113_spill] sm:$0xff] }
  0xd7   : > { %7138 = vst [vmem:[#allocation65_spill] sm:$0xff] %v5686_v21  ;;  %7140 = vst [vmem:[#allocation66_spill] sm:$0xff] %v5689_v4  ;;  %v1953_v49 = vrot.slane %v7149_v47, %v7145_v38  ;;  %v1957_v50 = vrot.slane %v7149_v47, %v7147_v12  ;;  %v1961_v35 = vrot.slane %v7150_v2, %v7145_v38 }
  0xd8   : > { %7142 = vst [vmem:[#allocation67_spill] sm:$0xff] %v5692_v37  ;;  %7144 = vst [vmem:[#allocation68_spill] sm:$0xff] %v5695_v48  ;;  %v1965_v8 = vrot.slane %v7150_v2, %v7147_v12  ;;  %v1969_v59 = vrot.slane %v7151_v3, %v7145_v38  ;;  %v1973_v5 = vrot.slane %v7151_v3, %v7147_v12  ;;  %v4162_v48 = vld [vmem:[%s5274_s20 + $0x1e0] sm:$0xff] }
  0xd9   : > { %v1977_v9 = vrot.slane %v7152_v36, %v7145_v38  ;;  %v1981_v18 = vrot.slane %v7152_v36, %v7147_v12  ;;  %v1985_v57 = vrot.slane %v7153_v24, %v7145_v38  ;;  %v1989_v52 = vrot.slane %v7153_v24, %v7147_v12 }
  0xda   : > { %v1993_v60 = vrot.slane %v7154_v16, %v7145_v38  ;;  %v1997_v58 = vrot.slane %v7154_v16, %v7147_v12  ;;  %v2001_v61 = vrot.slane %v7155_v46, %v7145_v38  ;;  %v2005_v20 = vrot.slane %v7155_v46, %v7147_v12 }
  0xdb   : > { %v2009_v34 = vrot.slane %v7156_v39, %v7145_v38  ;;  %v2013_v56 = vrot.slane %v7156_v39, %v7147_v12  ;;  %v2017_v42 = vrot.slane %v7157_v32, %v7145_v38  ;;  %v2021_v63 = vrot.slane %v7157_v32, %v7147_v12 }
  0xdc   : > { %v2025_v23 = vrot.slane %v7158_v54, %v7145_v38  ;;  %v2029_v15 = vrot.slane %v7158_v54, %v7147_v12  ;;  %v2033_v0 = vrot.slane %v7159_v28, %v7145_v38  ;;  %v2037_v17 = vrot.slane %v7159_v28, %v7147_v12  ;;  %v4152_v28 = vld [vmem:[%s5274_s20 + $0x190] sm:$0xff] }
  0xdd   : > { %v2041_v26 = vrot.slane %v7160_v40, %v7145_v38  ;;  %v2045_v19 = vrot.slane %v7160_v40, %v7147_v12  ;;  %v2049_v13 = vrot.slane %v7161_v55, %v7145_v38  ;;  %v2053_v1 = vrot.slane %v7161_v55, %v7147_v12  ;;  %v4154_v55 = vld [vmem:[%s5274_s20 + $0x1a0] sm:$0xff] }
  0xde   : > { %v2057_v43 = vrot.slane %v7162_v45, %v7145_v38  ;;  %v2061_v30 = vrot.slane %v7162_v45, %v7147_v12  ;;  %v5762_v47 = vrot.slane %v1937_v25, %v7145_v38  ;;  %v5765_v2 = vrot.slane %v1941_v29, %v7145_v38 }
  0xdf   : > { %v5768_v3 = vrot.slane %v1945_v62, %v7145_v38  ;;  %v5771_v36 = vrot.slane %v1949_v31, %v7145_v38  ;;  %v5774_v24 = vrot.slane %v1953_v49, %v7145_v38  ;;  %v2117_v16 = vrot.slane %v1957_v50, %v7145_v38 }
  0xe0   : > { %v2121_v46 = vrot.slane %v1961_v35, %v7145_v38  ;;  %v2125_v39 = vrot.slane %v1965_v8, %v7145_v38  ;;  %v2129_v25 = vrot.slane %v1969_v59, %v7145_v38  ;;  %v2133_v29 = vrot.slane %v1973_v5, %v7145_v38 }
  0xe1   : > { %v2137_v32 = vrot.slane %v1977_v9, %v7145_v38  ;;  %v2141_v62 = vrot.slane %v1981_v18, %v7145_v38  ;;  %v2145_v31 = vrot.slane %v1985_v57, %v7145_v38  ;;  %v2149_v49 = vrot.slane %v1989_v52, %v7145_v38 }
  0xe2   : > { %v2153_v54 = vrot.slane %v1993_v60, %v7145_v38  ;;  %v2157_v50 = vrot.slane %v1997_v58, %v7145_v38  ;;  %v2161_v35 = vrot.slane %v2001_v61, %v7145_v38  ;;  %v2165_v8 = vrot.slane %v2005_v20, %v7145_v38 }
  0xe3   : > { %v2169_v59 = vrot.slane %v2009_v34, %v7145_v38  ;;  %v2173_v5 = vrot.slane %v2013_v56, %v7145_v38  ;;  %v2177_v9 = vrot.slane %v2017_v42, %v7145_v38  ;;  %v2181_v18 = vrot.slane %v2021_v63, %v7145_v38  ;;  %v4150_v34 = vld [vmem:[%s5274_s20 + $0x180] sm:$0xff] }
  0xe4   : > { %v2185_v57 = vrot.slane %v2025_v23, %v7145_v38  ;;  %v2189_v52 = vrot.slane %v2029_v15, %v7145_v38  ;;  %v2193_v60 = vrot.slane %v2033_v0, %v7145_v38  ;;  %v2197_v58 = vrot.slane %v2037_v17, %v7145_v38  ;;  %v4151_v15 = vld [vmem:[%s5274_s20 + $0x188] sm:$0xff]  ;;  %v4153_v0 = vld [vmem:[%s5274_s20 + $0x198] sm:$0xff] }
  0xe5   : > { %v2201_v61 = vrot.slane %v2041_v26, %v7145_v38  ;;  %v2205_v20 = vrot.slane %v2045_v19, %v7145_v38  ;;  %v2209_v56 = vrot.slane %v2049_v13, %v7145_v38  ;;  %v2213_v42 = vrot.slane %v2053_v1, %v7145_v38  ;;  %v4155_v13 = vld [vmem:[%s5274_s20 + $0x1a8] sm:$0xff]  ;;  %v4156_v1 = vld [vmem:[%s5274_s20 + $0x1b0] sm:$0xff] }
  0xe6   : > { %v2217_v63 = vrot.slane %v2057_v43, %v7145_v38  ;;  %v2221_v23 = vrot.slane %v2061_v30, %v7145_v38  ;;  %v2254_v17 = vcombine.low %v5762_v47, %v5765_v2  ;;  %v2255_v40 = vcombine.low %v5768_v3, %v5771_v36  ;;  %v4157_v38 = vld [vmem:[%s5274_s20 + $0x1b8] sm:$0xff]  ;;  %v4158_v47 = vld [vmem:[%s5274_s20 + $0x1c0] sm:$0xff]  ;;  %v4159_v2 = vld [vmem:[%s5274_s20 + $0x1c8] sm:$0xff] }
  0xe7   : > { %v2256_v26 = vcombine.low %v5774_v24, %v2117_v16  ;;  %v2257_v19 = vcombine.low %v2121_v46, %v2125_v39  ;;  %v2258_v45 = vcombine.low %v2129_v25, %v2133_v29  ;;  %v2259_v43 = vcombine.low %v2137_v32, %v2141_v62  ;;  %v4160_v46 = vld [vmem:[%s5274_s20 + $0x1d0] sm:$0xff]  ;;  %v4161_v39 = vld [vmem:[%s5274_s20 + $0x1d8] sm:$0xff]  ;;  %v4163_v29 = vld [vmem:[%s5274_s20 + $0x1e8] sm:$0xff] }
  0xe8   : > { %v2260_v30 = vcombine.low %v2145_v31, %v2149_v49  ;;  %v2261_v12 = vcombine.low %v2153_v54, %v2157_v50  ;;  %v2262_v3 = vcombine.low %v2161_v35, %v2165_v8  ;;  %v2263_v36 = vcombine.low %v2169_v59, %v2173_v5  ;;  %v4164_v32 = vld [vmem:[%s5274_s20 + $0x1f0] sm:$0xff]  ;;  %v4165_v62 = vld [vmem:[%s5274_s20 + $0x1f8] sm:$0xff] }
  0xe9   : > { %v2264_v24 = vcombine.low %v2177_v9, %v2181_v18  ;;  %v2265_v16 = vcombine.low %v2185_v57, %v2189_v52  ;;  %v2266_v37 = vcombine.low %v2193_v60, %v2197_v58  ;;  %v2267_v4 = vcombine.low %v2201_v61, %v2205_v20 }
  0xea   : > { %v2268_v21 = vcombine.low %v2209_v56, %v2213_v42  ;;  %v2269_v25 = vcombine.low %v2217_v63, %v2221_v23  ;;  %v2286_v31 = vmul.f32 %v4150_v34, %v2254_v17  ;;  %v2287_v49 = vmul.f32 %v4151_v15, %v2255_v40  ;;  %v7176_v63 = vld [vmem:[#allocation19_spill] sm:$0xff] }
  0xeb   : > { %v2288_v54 = vmul.f32 %v4152_v28, %v2256_v26  ;;  %v2289_v50 = vmul.f32 %v4153_v0, %v2257_v19  ;;  %v2290_v41 = vmul.f32 %v4154_v55, %v2258_v45  ;;  %v2291_v10 = vmul.f32 %v4155_v13, %v2259_v43  ;;  %v7177_v15 = vld [vmem:[#allocation3_spill] sm:$0xff]  ;;  %v7178_v0 = vld [vmem:[#allocation20_spill] sm:$0xff]  ;;  %v7179_v26 = vld [vmem:[#allocation21_spill] sm:$0xff] }
  0xec   : > { %v2292_v35 = vmul.f32 %v4156_v1, %v2260_v30  ;;  %v2293_v8 = vmul.f32 %v4157_v38, %v2261_v12  ;;  %v2294_v59 = vmul.f32 %v4158_v47, %v2262_v3  ;;  %v2295_v5 = vmul.f32 %v4159_v2, %v2263_v36  ;;  %v7180_v13 = vld [vmem:[#allocation22_spill] sm:$0xff]  ;;  %v7181_v43 = vld [vmem:[#allocation23_spill] sm:$0xff]  ;;  %v7182_v2 = vld [vmem:[#allocation24_spill] sm:$0xff] }
  0xed   : > { %v2296_v9 = vmul.f32 %v4160_v46, %v2264_v24  ;;  %v2297_v18 = vmul.f32 %v4161_v39, %v2265_v16  ;;  %v2298_v57 = vmul.f32 %v4162_v48, %v2266_v37  ;;  %v2299_v52 = vmul.f32 %v4163_v29, %v2267_v4  ;;  %v7183_v24 = vld [vmem:[#allocation25_spill] sm:$0xff]  ;;  %v7184_v39 = vld [vmem:[#allocation26_spill] sm:$0xff] }
  0xee   : > { %v2300_v60 = vmul.f32 %v4164_v32, %v2268_v21  ;;  %v2301_v58 = vmul.f32 %v4165_v62, %v2269_v25  ;;  %v5825_v61 = vadd.f32 %v2286_v31, %v5650_v6  ;;  %v5828_v20 = vadd.f32 %v2287_v49, %v5653_v14  ;;  %v7185_v32 = vld [vmem:[#allocation27_spill] sm:$0xff]  ;;  %v7186_v49 = vld [vmem:[#allocation28_spill] sm:$0xff] }
  0xef   : > { %v5831_v34 = vadd.f32 %v2288_v54, %v5656_v7  ;;  %v5834_v56 = vadd.f32 %v2289_v50, %v5659_v22  ;;  %v5837_v38 = vadd.f32 %v2290_v41, %v5662_v33  ;;  %v5840_v37 = vadd.f32 %v2291_v10, %v5665_v11  ;;  %v7163_v22 = vld [vmem:[#allocation63_spill] sm:$0xff]  ;;  %v7165_v33 = vld [vmem:[#allocation64_spill] sm:$0xff]  ;;  %v7167_v11 = vld [vmem:[#allocation65_spill] sm:$0xff] }
  0xf0   : > { %v5843_v21 = vadd.f32 %v2292_v35, %v5668_v53  ;;  %v5846_v6 = vadd.f32 %v2293_v8, %v5671_v44  ;;  %v5849_v14 = vadd.f32 %v2294_v59, %v5674_v27  ;;  %v5852_v7 = vadd.f32 %v2295_v5, %v5677_v51  ;;  %v7169_v53 = vld [vmem:[#allocation66_spill] sm:$0xff]  ;;  %v7171_v44 = vld [vmem:[#allocation67_spill] sm:$0xff]  ;;  %v7173_v27 = vld [vmem:[#allocation68_spill] sm:$0xff] }
  0xf1   : > { %v5855_v4 = vadd.f32 %v2296_v9, %v7163_v22  ;;  %v5858_v41 = vadd.f32 %v2297_v18, %v7165_v33  ;;  %v5861_v10 = vadd.f32 %v2298_v57, %v7167_v11  ;;  %v5864_v48 = vadd.f32 %v2299_v52, %v7169_v53  ;;  %v7175_v51 = vld [vmem:[#allocation2_spill] sm:$0xff]  ;;  %v7187_v35 = vld [vmem:[#allocation29_spill] sm:$0xff]  ;;  %v7189_v57 = vld [vmem:[#allocation31_spill] sm:$0xff] }
  0xf2   : > { %v5867_v12 = vadd.f32 %v2300_v60, %v7171_v44  ;;  %v5870_v42 = vadd.f32 %v2301_v58, %v7173_v27  ;;  %v2354_v23 = vrot.slane %v7176_v63, %v7175_v51  ;;  %v2358_v28 = vrot.slane %v7176_v63, %v7177_v15  ;;  %v7188_v5 = vld [vmem:[#allocation30_spill] sm:$0xff]  ;;  %v7190_v58 = vld [vmem:[#allocation32_spill] sm:$0xff]  ;;  %v7191_v11 = vld [vmem:[#allocation33_spill] sm:$0xff] }
  0xf3   : > { %7164 = vst [vmem:[#allocation69_spill] sm:$0xff] %v5855_v4  ;;  %7166 = vst [vmem:[#allocation70_spill] sm:$0xff] %v5858_v41  ;;  %v2362_v17 = vrot.slane %v7178_v0, %v7175_v51  ;;  %v2366_v40 = vrot.slane %v7178_v0, %v7177_v15  ;;  %v2370_v19 = vrot.slane %v7179_v26, %v7175_v51  ;;  %v7192_v27 = vld [vmem:[#allocation9_spill] sm:$0xff] }
  0xf4   : > { %7168 = vst [vmem:[#allocation71_spill] sm:$0xff] %v5861_v10  ;;  %7170 = vst [vmem:[#allocation72_spill] sm:$0xff] %v5864_v48  ;;  %v2374_v55 = vrot.slane %v7179_v26, %v7177_v15  ;;  %v2378_v1 = vrot.slane %v7180_v13, %v7175_v51  ;;  %v2382_v45 = vrot.slane %v7180_v13, %v7177_v15 }
  0xf5   : > { %7172 = vst [vmem:[#allocation73_spill] sm:$0xff] %v5867_v12  ;;  %7174 = vst [vmem:[#allocation74_spill] sm:$0xff] %v5870_v42  ;;  %v2386_v30 = vrot.slane %v7181_v43, %v7175_v51  ;;  %v2390_v47 = vrot.slane %v7181_v43, %v7177_v15  ;;  %v2394_v3 = vrot.slane %v7182_v2, %v7175_v51  ;;  %v4178_v42 = vld [vmem:[%s5274_s20 + $0x260] sm:$0xff] }
  0xf6   : > { %v2398_v36 = vrot.slane %v7182_v2, %v7177_v15  ;;  %v2402_v16 = vrot.slane %v7183_v24, %v7175_v51  ;;  %v2406_v46 = vrot.slane %v7183_v24, %v7177_v15  ;;  %v2410_v25 = vrot.slane %v7184_v39, %v7175_v51 }
  0xf7   : > { %v2414_v29 = vrot.slane %v7184_v39, %v7177_v15  ;;  %v2418_v62 = vrot.slane %v7185_v32, %v7175_v51  ;;  %v2422_v31 = vrot.slane %v7185_v32, %v7177_v15  ;;  %v2426_v54 = vrot.slane %v7186_v49, %v7175_v51 }
  0xf8   : > { %v2430_v50 = vrot.slane %v7186_v49, %v7177_v15  ;;  %v2434_v8 = vrot.slane %v7187_v35, %v7175_v51  ;;  %v2438_v59 = vrot.slane %v7187_v35, %v7177_v15  ;;  %v2442_v9 = vrot.slane %v7188_v5, %v7175_v51 }
  0xf9   : > { %v2446_v18 = vrot.slane %v7188_v5, %v7177_v15  ;;  %v2450_v52 = vrot.slane %v7189_v57, %v7175_v51  ;;  %v2454_v60 = vrot.slane %v7189_v57, %v7177_v15  ;;  %v2458_v22 = vrot.slane %v7190_v58, %v7175_v51  ;;  %v4168_v57 = vld [vmem:[%s5274_s20 + $0x210] sm:$0xff] }
  0xfa   : > { %v2462_v33 = vrot.slane %v7190_v58, %v7177_v15  ;;  %v2466_v53 = vrot.slane %v7191_v11, %v7175_v51  ;;  %v2470_v44 = vrot.slane %v7191_v11, %v7177_v15  ;;  %v2474_v63 = vrot.slane %v7192_v27, %v7175_v51  ;;  %v4170_v11 = vld [vmem:[%s5274_s20 + $0x220] sm:$0xff] }
  0xfb   : > { %v2478_v0 = vrot.slane %v7192_v27, %v7177_v15  ;;  %v5937_v26 = vrot.slane %v2354_v23, %v7175_v51  ;;  %v5940_v13 = vrot.slane %v2358_v28, %v7175_v51  ;;  %v5943_v43 = vrot.slane %v2362_v17, %v7175_v51 }
  0xfc   : > { %v5946_v2 = vrot.slane %v2366_v40, %v7175_v51  ;;  %v5949_v24 = vrot.slane %v2370_v19, %v7175_v51  ;;  %v2534_v39 = vrot.slane %v2374_v55, %v7175_v51  ;;  %v2538_v32 = vrot.slane %v2378_v1, %v7175_v51 }
  0xfd   : > { %v2542_v49 = vrot.slane %v2382_v45, %v7175_v51  ;;  %v2546_v23 = vrot.slane %v2386_v30, %v7175_v51  ;;  %v2550_v28 = vrot.slane %v2390_v47, %v7175_v51  ;;  %v2554_v35 = vrot.slane %v2394_v3, %v7175_v51 }
  0xfe   : > { %v2558_v17 = vrot.slane %v2398_v36, %v7175_v51  ;;  %v2562_v40 = vrot.slane %v2402_v16, %v7175_v51  ;;  %v2566_v19 = vrot.slane %v2406_v46, %v7175_v51  ;;  %v2570_v5 = vrot.slane %v2410_v25, %v7175_v51 }
  0xff   : > { %v2574_v55 = vrot.slane %v2414_v29, %v7175_v51  ;;  %v2578_v1 = vrot.slane %v2418_v62, %v7175_v51  ;;  %v2582_v45 = vrot.slane %v2422_v31, %v7175_v51  ;;  %v2586_v30 = vrot.slane %v2426_v54, %v7175_v51  ;;  %v4166_v54 = vld [vmem:[%s5274_s20 + $0x200] sm:$0xff] }
 0x100   : > { %v2590_v47 = vrot.slane %v2430_v50, %v7175_v51  ;;  %v2594_v3 = vrot.slane %v2434_v8, %v7175_v51  ;;  %v2598_v36 = vrot.slane %v2438_v59, %v7175_v51  ;;  %v2602_v16 = vrot.slane %v2442_v9, %v7175_v51 }
 0x101   : > { %v2606_v46 = vrot.slane %v2446_v18, %v7175_v51  ;;  %v2610_v25 = vrot.slane %v2450_v52, %v7175_v51  ;;  %v2614_v29 = vrot.slane %v2454_v60, %v7175_v51  ;;  %v2618_v62 = vrot.slane %v2458_v22, %v7175_v51  ;;  %v4167_v18 = vld [vmem:[%s5274_s20 + $0x208] sm:$0xff]  ;;  %v4169_v52 = vld [vmem:[%s5274_s20 + $0x218] sm:$0xff] }
 0x102   : > { %v2622_v31 = vrot.slane %v2462_v33, %v7175_v51  ;;  %v2626_v50 = vrot.slane %v2466_v53, %v7175_v51  ;;  %v2630_v8 = vrot.slane %v2470_v44, %v7175_v51  ;;  %v2634_v59 = vrot.slane %v2474_v63, %v7175_v51  ;;  %v4171_v53 = vld [vmem:[%s5274_s20 + $0x228] sm:$0xff]  ;;  %v4172_v44 = vld [vmem:[%s5274_s20 + $0x230] sm:$0xff] }
 0x103   : > { %v2638_v9 = vrot.slane %v2478_v0, %v7175_v51  ;;  %v2671_v60 = vcombine.low %v5937_v26, %v5940_v13  ;;  %v2672_v58 = vcombine.low %v5943_v43, %v5946_v2  ;;  %v2673_v22 = vcombine.low %v5949_v24, %v2534_v39  ;;  %v4173_v51 = vld [vmem:[%s5274_s20 + $0x238] sm:$0xff]  ;;  %v4174_v26 = vld [vmem:[%s5274_s20 + $0x240] sm:$0xff]  ;;  %v4175_v13 = vld [vmem:[%s5274_s20 + $0x248] sm:$0xff] }
 0x104   : > { %v2674_v33 = vcombine.low %v2538_v32, %v2542_v49  ;;  %v2675_v27 = vcombine.low %v2546_v23, %v2550_v28  ;;  %v2676_v63 = vcombine.low %v2554_v35, %v2558_v17  ;;  %v2677_v0 = vcombine.low %v2562_v40, %v2566_v19  ;;  %v4176_v32 = vld [vmem:[%s5274_s20 + $0x250] sm:$0xff]  ;;  %v4177_v49 = vld [vmem:[%s5274_s20 + $0x258] sm:$0xff]  ;;  %v4179_v28 = vld [vmem:[%s5274_s20 + $0x268] sm:$0xff] }
 0x105   : > { %v2678_v15 = vcombine.low %v2570_v5, %v2574_v55  ;;  %v2679_v43 = vcombine.low %v2578_v1, %v2582_v45  ;;  %v2680_v2 = vcombine.low %v2586_v30, %v2590_v47  ;;  %v2681_v24 = vcombine.low %v2594_v3, %v2598_v36  ;;  %v4180_v35 = vld [vmem:[%s5274_s20 + $0x270] sm:$0xff]  ;;  %v4181_v17 = vld [vmem:[%s5274_s20 + $0x278] sm:$0xff] }
 0x106   : > { %v2682_v39 = vcombine.low %v2602_v16, %v2606_v46  ;;  %v2683_v12 = vcombine.low %v2610_v25, %v2614_v29  ;;  %v2684_v48 = vcombine.low %v2618_v62, %v2622_v31  ;;  %v2685_v10 = vcombine.low %v2626_v50, %v2630_v8 }
 0x107   : > { %v2686_v23 = vcombine.low %v2634_v59, %v2638_v9  ;;  %v2703_v40 = vmul.f32 %v4166_v54, %v2671_v60  ;;  %v2704_v19 = vmul.f32 %v4167_v18, %v2672_v58  ;;  %v2705_v5 = vmul.f32 %v4168_v57, %v2673_v22  ;;  %v7206_v59 = vld [vmem:[#allocation34_spill] sm:$0xff]  ;;  %v7207_v18 = vld [vmem:[#allocation3_spill] sm:$0xff] }
 0x108   : > { %v2706_v55 = vmul.f32 %v4169_v52, %v2674_v33  ;;  %v2707_v41 = vmul.f32 %v4170_v11, %v2675_v27  ;;  %v2708_v4 = vmul.f32 %v4171_v53, %v2676_v63  ;;  %v2709_v1 = vmul.f32 %v4172_v44, %v2677_v0  ;;  %v7208_v52 = vld [vmem:[#allocation38_spill] sm:$0xff]  ;;  %v7209_v22 = vld [vmem:[#allocation39_spill] sm:$0xff]  ;;  %v7210_v53 = vld [vmem:[#allocation40_spill] sm:$0xff] }
 0x109   : > { %v2710_v45 = vmul.f32 %v4173_v51, %v2678_v15  ;;  %v2711_v30 = vmul.f32 %v4174_v26, %v2679_v43  ;;  %v2712_v47 = vmul.f32 %v4175_v13, %v2680_v2  ;;  %v2713_v3 = vmul.f32 %v4176_v32, %v2681_v24  ;;  %v7211_v63 = vld [vmem:[#allocation41_spill] sm:$0xff]  ;;  %v7212_v13 = vld [vmem:[#allocation42_spill] sm:$0xff]  ;;  %v7213_v24 = vld [vmem:[#allocation43_spill] sm:$0xff] }
 0x10a   : > { %v2714_v36 = vmul.f32 %v4177_v49, %v2682_v39  ;;  %v2715_v16 = vmul.f32 %v4178_v42, %v2683_v12  ;;  %v2716_v46 = vmul.f32 %v4179_v28, %v2684_v48  ;;  %v2717_v25 = vmul.f32 %v4180_v35, %v2685_v10  ;;  %v7214_v49 = vld [vmem:[#allocation114_spill] sm:$0xff]  ;;  %v7215_v35 = vld [vmem:[#allocation115_spill] sm:$0xff] }
 0x10b   : > { %v2718_v29 = vmul.f32 %v4181_v17, %v2686_v23  ;;  %v6000_v62 = vadd.f32 %v2703_v40, %v5825_v61  ;;  %v6003_v31 = vadd.f32 %v2704_v19, %v5828_v20  ;;  %v6006_v54 = vadd.f32 %v2705_v5, %v5831_v34  ;;  %v7216_v19 = vld [vmem:[#allocation116_spill] sm:$0xff] }
 0x10c   : > { %v6009_v50 = vadd.f32 %v2706_v55, %v5834_v56  ;;  %v6012_v51 = vadd.f32 %v2707_v41, %v5837_v38  ;;  %v6015_v12 = vadd.f32 %v2708_v4, %v5840_v37  ;;  %v6018_v10 = vadd.f32 %v2709_v1, %v5843_v21  ;;  %v7193_v56 = vld [vmem:[#allocation69_spill] sm:$0xff]  ;;  %v7195_v38 = vld [vmem:[#allocation70_spill] sm:$0xff]  ;;  %v7197_v37 = vld [vmem:[#allocation71_spill] sm:$0xff] }
 0x10d   : > { %v6021_v61 = vadd.f32 %v2710_v45, %v5846_v6  ;;  %v6024_v20 = vadd.f32 %v2711_v30, %v5849_v14  ;;  %v6027_v34 = vadd.f32 %v2712_v47, %v5852_v7  ;;  %v6030_v48 = vadd.f32 %v2713_v3, %v7193_v56  ;;  %v7199_v21 = vld [vmem:[#allocation72_spill] sm:$0xff]  ;;  %v7201_v6 = vld [vmem:[#allocation73_spill] sm:$0xff]  ;;  %v7203_v14 = vld [vmem:[#allocation74_spill] sm:$0xff] }
 0x10e   : > { %v6033_v41 = vadd.f32 %v2714_v36, %v7195_v38  ;;  %v6036_v4 = vadd.f32 %v2715_v16, %v7197_v37  ;;  %v6039_v42 = vadd.f32 %v2716_v46, %v7199_v21  ;;  %v6042_v15 = vadd.f32 %v2717_v25, %v7201_v6  ;;  %v7205_v7 = vld [vmem:[#allocation2_spill] sm:$0xff]  ;;  %v7217_v1 = vld [vmem:[#allocation117_spill] sm:$0xff]  ;;  %v7219_v16 = vld [vmem:[#allocation119_spill] sm:$0xff] }
 0x10f   : > { %7194 = vst [vmem:[#allocation75_spill] sm:$0xff] %v6030_v48  ;;  %v6045_v8 = vadd.f32 %v2718_v29, %v7203_v14  ;;  %v2771_v9 = vrot.slane %v7206_v59, %v7205_v7  ;;  %v2775_v57 = vrot.slane %v7206_v59, %v7207_v18  ;;  %v2779_v60 = vrot.slane %v7208_v52, %v7205_v7  ;;  %v7218_v47 = vld [vmem:[#allocation118_spill] sm:$0xff]  ;;  %v7220_v29 = vld [vmem:[#allocation120_spill] sm:$0xff]  ;;  %v7221_v37 = vld [vmem:[#allocation121_spill] sm:$0xff] }
 0x110   : > { %7196 = vst [vmem:[#allocation76_spill] sm:$0xff] %v6033_v41  ;;  %7198 = vst [vmem:[#allocation77_spill] sm:$0xff] %v6036_v4  ;;  %v2783_v58 = vrot.slane %v7208_v52, %v7207_v18  ;;  %v2787_v33 = vrot.slane %v7209_v22, %v7205_v7  ;;  %v2791_v11 = vrot.slane %v7209_v22, %v7207_v18  ;;  %v7222_v14 = vld [vmem:[#allocation122_spill] sm:$0xff] }
 0x111   : > { %7200 = vst [vmem:[#allocation78_spill] sm:$0xff] %v6039_v42  ;;  %7202 = vst [vmem:[#allocation79_spill] sm:$0xff] %v6042_v15  ;;  %v2795_v44 = vrot.slane %v7210_v53, %v7205_v7  ;;  %v2799_v27 = vrot.slane %v7210_v53, %v7207_v18  ;;  %v2803_v0 = vrot.slane %v7211_v63, %v7205_v7 }
 0x112   : > { %7204 = vst [vmem:[#allocation80_spill] sm:$0xff] %v6045_v8  ;;  %v2807_v26 = vrot.slane %v7211_v63, %v7207_v18  ;;  %v2811_v43 = vrot.slane %v7212_v13, %v7205_v7  ;;  %v2815_v2 = vrot.slane %v7212_v13, %v7207_v18  ;;  %v2819_v39 = vrot.slane %v7213_v24, %v7205_v7  ;;  %v4194_v8 = vld [vmem:[%s5274_s20 + $0x2e0] sm:$0xff] }
 0x113   : > { %v2823_v32 = vrot.slane %v7213_v24, %v7207_v18  ;;  %v2827_v23 = vrot.slane %v7214_v49, %v7205_v7  ;;  %v2831_v28 = vrot.slane %v7214_v49, %v7207_v18  ;;  %v2835_v17 = vrot.slane %v7215_v35, %v7205_v7 }
 0x114   : > { %v2839_v40 = vrot.slane %v7215_v35, %v7207_v18  ;;  %v2843_v5 = vrot.slane %v7216_v19, %v7205_v7  ;;  %v2847_v55 = vrot.slane %v7216_v19, %v7207_v18  ;;  %v2851_v45 = vrot.slane %v7217_v1, %v7205_v7 }
 0x115   : > { %v2855_v30 = vrot.slane %v7217_v1, %v7207_v18  ;;  %v2859_v3 = vrot.slane %v7218_v47, %v7205_v7  ;;  %v2863_v36 = vrot.slane %v7218_v47, %v7207_v18  ;;  %v2867_v46 = vrot.slane %v7219_v16, %v7205_v7 }
 0x116   : > { %v2871_v25 = vrot.slane %v7219_v16, %v7207_v18  ;;  %v2875_v56 = vrot.slane %v7220_v29, %v7205_v7  ;;  %v2879_v38 = vrot.slane %v7220_v29, %v7207_v18  ;;  %v2883_v21 = vrot.slane %v7221_v37, %v7205_v7  ;;  %v4184_v16 = vld [vmem:[%s5274_s20 + $0x290] sm:$0xff] }
 0x117   : > { %v2887_v6 = vrot.slane %v7221_v37, %v7207_v18  ;;  %v2891_v59 = vrot.slane %v7222_v14, %v7205_v7  ;;  %v2895_v52 = vrot.slane %v7222_v14, %v7207_v18  ;;  %v6112_v22 = vrot.slane %v2771_v9, %v7205_v7  ;;  %v4186_v37 = vld [vmem:[%s5274_s20 + $0x2a0] sm:$0xff] }
 0x118   : > { %v6115_v53 = vrot.slane %v2775_v57, %v7205_v7  ;;  %v6118_v63 = vrot.slane %v2779_v60, %v7205_v7  ;;  %v6121_v13 = vrot.slane %v2783_v58, %v7205_v7  ;;  %v6124_v24 = vrot.slane %v2787_v33, %v7205_v7 }
 0x119   : > { %v2951_v49 = vrot.slane %v2791_v11, %v7205_v7  ;;  %v2955_v35 = vrot.slane %v2795_v44, %v7205_v7  ;;  %v2959_v19 = vrot.slane %v2799_v27, %v7205_v7  ;;  %v2963_v9 = vrot.slane %v2803_v0, %v7205_v7 }
 0x11a   : > { %v2967_v57 = vrot.slane %v2807_v26, %v7205_v7  ;;  %v2971_v1 = vrot.slane %v2811_v43, %v7205_v7  ;;  %v2975_v60 = vrot.slane %v2815_v2, %v7205_v7  ;;  %v2979_v58 = vrot.slane %v2819_v39, %v7205_v7 }
 0x11b   : > { %v2983_v33 = vrot.slane %v2823_v32, %v7205_v7  ;;  %v2987_v47 = vrot.slane %v2827_v23, %v7205_v7  ;;  %v2991_v11 = vrot.slane %v2831_v28, %v7205_v7  ;;  %v2995_v44 = vrot.slane %v2835_v17, %v7205_v7 }
 0x11c   : > { %v2999_v27 = vrot.slane %v2839_v40, %v7205_v7  ;;  %v3003_v0 = vrot.slane %v2843_v5, %v7205_v7  ;;  %v3007_v26 = vrot.slane %v2847_v55, %v7205_v7  ;;  %v3011_v43 = vrot.slane %v2851_v45, %v7205_v7  ;;  %v4182_v5 = vld [vmem:[%s5274_s20 + $0x280] sm:$0xff] }
 0x11d   : > { %v3015_v2 = vrot.slane %v2855_v30, %v7205_v7  ;;  %v3019_v39 = vrot.slane %v2859_v3, %v7205_v7  ;;  %v3023_v32 = vrot.slane %v2863_v36, %v7205_v7  ;;  %v3027_v23 = vrot.slane %v2867_v46, %v7205_v7  ;;  %v4183_v36 = vld [vmem:[%s5274_s20 + $0x288] sm:$0xff]  ;;  %v4185_v46 = vld [vmem:[%s5274_s20 + $0x298] sm:$0xff] }
 0x11e   : > { %v3031_v28 = vrot.slane %v2871_v25, %v7205_v7  ;;  %v3035_v17 = vrot.slane %v2875_v56, %v7205_v7  ;;  %v3039_v40 = vrot.slane %v2879_v38, %v7205_v7  ;;  %v3043_v55 = vrot.slane %v2883_v21, %v7205_v7  ;;  %v4187_v21 = vld [vmem:[%s5274_s20 + $0x2a8] sm:$0xff] }
 0x11f   : > { %v3047_v45 = vrot.slane %v2887_v6, %v7205_v7  ;;  %v3051_v30 = vrot.slane %v2891_v59, %v7205_v7  ;;  %v3055_v3 = vrot.slane %v2895_v52, %v7205_v7  ;;  %v3088_v25 = vcombine.low %v6112_v22, %v6115_v53  ;;  %v4188_v6 = vld [vmem:[%s5274_s20 + $0x2b0] sm:$0xff]  ;;  %v4189_v7 = vld [vmem:[%s5274_s20 + $0x2b8] sm:$0xff]  ;;  %v4190_v22 = vld [vmem:[%s5274_s20 + $0x2c0] sm:$0xff] }
 0x120   : > { %v3089_v29 = vcombine.low %v6118_v63, %v6121_v13  ;;  %v3090_v56 = vcombine.low %v6124_v24, %v2951_v49  ;;  %v3091_v38 = vcombine.low %v2955_v35, %v2959_v19  ;;  %v3092_v14 = vcombine.low %v2963_v9, %v2967_v57  ;;  %v4191_v53 = vld [vmem:[%s5274_s20 + $0x2c8] sm:$0xff]  ;;  %v4192_v35 = vld [vmem:[%s5274_s20 + $0x2d0] sm:$0xff]  ;;  %v4193_v19 = vld [vmem:[%s5274_s20 + $0x2d8] sm:$0xff] }
 0x121   : > { %v3093_v59 = vcombine.low %v2971_v1, %v2975_v60  ;;  %v3094_v52 = vcombine.low %v2979_v58, %v2983_v33  ;;  %v3095_v18 = vcombine.low %v2987_v47, %v2991_v11  ;;  %v3096_v63 = vcombine.low %v2995_v44, %v2999_v27  ;;  %v4195_v57 = vld [vmem:[%s5274_s20 + $0x2e8] sm:$0xff]  ;;  %v4196_v1 = vld [vmem:[%s5274_s20 + $0x2f0] sm:$0xff]  ;;  %v4197_v60 = vld [vmem:[%s5274_s20 + $0x2f8] sm:$0xff] }
 0x122   : > { %v3097_v13 = vcombine.low %v3003_v0, %v3007_v26  ;;  %v3098_v24 = vcombine.low %v3011_v43, %v3015_v2  ;;  %v3099_v49 = vcombine.low %v3019_v39, %v3023_v32  ;;  %v3100_v15 = vcombine.low %v3027_v23, %v3031_v28 }
 0x123   : > { %v3101_v42 = vcombine.low %v3035_v17, %v3039_v40  ;;  %v3102_v4 = vcombine.low %v3043_v55, %v3047_v45  ;;  %v3103_v9 = vcombine.low %v3051_v30, %v3055_v3  ;;  %v3120_v58 = vmul.f32 %v4182_v5, %v3088_v25  ;;  %v7236_v30 = vld [vmem:[#allocation83_spill] sm:$0xff] }
 0x124   : > { %v3121_v33 = vmul.f32 %v4183_v36, %v3089_v29  ;;  %v3122_v47 = vmul.f32 %v4184_v16, %v3090_v56  ;;  %v3123_v11 = vmul.f32 %v4185_v46, %v3091_v38  ;;  %v3124_v41 = vmul.f32 %v4186_v37, %v3092_v14  ;;  %v7237_v36 = vld [vmem:[#allocation3_spill] sm:$0xff]  ;;  %v7238_v46 = vld [vmem:[#allocation84_spill] sm:$0xff]  ;;  %v7239_v56 = vld [vmem:[#allocation85_spill] sm:$0xff] }
 0x125   : > { %v3125_v48 = vmul.f32 %v4187_v21, %v3093_v59  ;;  %v3126_v44 = vmul.f32 %v4188_v6, %v3094_v52  ;;  %v3127_v27 = vmul.f32 %v4189_v7, %v3095_v18  ;;  %v3128_v0 = vmul.f32 %v4190_v22, %v3096_v63  ;;  %v7240_v21 = vld [vmem:[#allocation86_spill] sm:$0xff]  ;;  %v7241_v59 = vld [vmem:[#allocation87_spill] sm:$0xff] }
 0x126   : > { %v3129_v26 = vmul.f32 %v4191_v53, %v3097_v13  ;;  %v3130_v43 = vmul.f32 %v4192_v35, %v3098_v24  ;;  %v3131_v2 = vmul.f32 %v4193_v19, %v3099_v49  ;;  %v3132_v39 = vmul.f32 %v4194_v8, %v3100_v15  ;;  %v7242_v53 = vld [vmem:[#allocation88_spill] sm:$0xff]  ;;  %v7243_v24 = vld [vmem:[#allocation89_spill] sm:$0xff]  ;;  %v7244_v19 = vld [vmem:[#allocation90_spill] sm:$0xff] }
 0x127   : > { %v3133_v32 = vmul.f32 %v4195_v57, %v3101_v42  ;;  %v3134_v23 = vmul.f32 %v4196_v1, %v3102_v4  ;;  %v3135_v28 = vmul.f32 %v4197_v60, %v3103_v9  ;;  %v6175_v17 = vadd.f32 %v3120_v58, %v6000_v62  ;;  %v7245_v1 = vld [vmem:[#allocation4_spill] sm:$0xff] }
 0x128   : > { %v6178_v40 = vadd.f32 %v3121_v33, %v6003_v31  ;;  %v6181_v5 = vadd.f32 %v3122_v47, %v6006_v54  ;;  %v6184_v55 = vadd.f32 %v3123_v11, %v6009_v50  ;;  %v6187_v7 = vadd.f32 %v3124_v41, %v6012_v51  ;;  %v7223_v50 = vld [vmem:[#allocation75_spill] sm:$0xff]  ;;  %v7225_v51 = vld [vmem:[#allocation76_spill] sm:$0xff] }
 0x129   : > { %v6190_v15 = vadd.f32 %v3125_v48, %v6015_v12  ;;  %v6193_v4 = vadd.f32 %v3126_v44, %v6018_v10  ;;  %v6196_v62 = vadd.f32 %v3127_v27, %v6021_v61  ;;  %v6199_v31 = vadd.f32 %v3128_v0, %v6024_v20  ;;  %v7227_v12 = vld [vmem:[#allocation77_spill] sm:$0xff]  ;;  %v7229_v10 = vld [vmem:[#allocation78_spill] sm:$0xff]  ;;  %v7231_v61 = vld [vmem:[#allocation79_spill] sm:$0xff] }
 0x12a   : > { %v6202_v54 = vadd.f32 %v3129_v26, %v6027_v34  ;;  %v6205_v42 = vadd.f32 %v3130_v43, %v7223_v50  ;;  %v6208_v41 = vadd.f32 %v3131_v2, %v7225_v51  ;;  %v6211_v48 = vadd.f32 %v3132_v39, %v7227_v12  ;;  %v7233_v20 = vld [vmem:[#allocation80_spill] sm:$0xff]  ;;  %v7235_v34 = vld [vmem:[#allocation2_spill] sm:$0xff]  ;;  %v7246_v33 = vld [vmem:[#allocation91_spill] sm:$0xff] }
 0x12b   : > { %v6214_v8 = vadd.f32 %v3133_v32, %v7229_v10  ;;  %v6217_v18 = vadd.f32 %v3134_v23, %v7231_v61  ;;  %v6220_v45 = vadd.f32 %v3135_v28, %v7233_v20  ;;  %v3188_v3 = vrot.slane %v7236_v30, %v7235_v34  ;;  %v7247_v44 = vld [vmem:[#allocation92_spill] sm:$0xff]  ;;  %v7248_v26 = vld [vmem:[#allocation93_spill] sm:$0xff]  ;;  %v7250_v28 = vld [vmem:[#allocation94_spill] sm:$0xff] }
 0x12c   : > { %7224 = vst [vmem:[#allocation81_spill] sm:$0xff] %v6205_v42  ;;  %7226 = vst [vmem:[#allocation82_spill] sm:$0xff] %v6208_v41  ;;  %v3192_v16 = vrot.slane %v7236_v30, %v7237_v36  ;;  %v3196_v25 = vrot.slane %v7238_v46, %v7235_v34  ;;  %v3200_v29 = vrot.slane %v7238_v46, %v7237_v36  ;;  %v7249_v39 = vld [vmem:[#allocation5_spill] sm:$0xff]  ;;  %v7251_v12 = vld [vmem:[#allocation6_spill] sm:$0xff] }
 0x12d   : > { %7228 = vst [vmem:[#allocation51_spill] sm:$0xff] %v6211_v48  ;;  %7230 = vst [vmem:[#allocation52_spill] sm:$0xff] %v6214_v8  ;;  %v3204_v38 = vrot.slane %v7239_v56, %v7235_v34  ;;  %v3208_v37 = vrot.slane %v7239_v56, %v7237_v36  ;;  %v3212_v6 = vrot.slane %v7240_v21, %v7235_v34  ;;  %v7252_v20 = vld [vmem:[#allocation95_spill] sm:$0xff] }
 0x12e   : > { %7232 = vst [vmem:[#allocation53_spill] sm:$0xff] %v6217_v18  ;;  %7234 = vst [vmem:[#allocation54_spill] sm:$0xff] %v6220_v45  ;;  %v3216_v14 = vrot.slane %v7240_v21, %v7237_v36  ;;  %v3220_v52 = vrot.slane %v7241_v59, %v7235_v34  ;;  %v3224_v22 = vrot.slane %v7241_v59, %v7237_v36  ;;  %v4210_v45 = vld [vmem:[%s5274_s20 + $0x360] sm:$0xff] }
 0x12f   : > { %v3228_v63 = vrot.slane %v7242_v53, %v7235_v34  ;;  %v3232_v13 = vrot.slane %v7242_v53, %v7237_v36  ;;  %v3236_v49 = vrot.slane %v7243_v24, %v7235_v34  ;;  %v3240_v35 = vrot.slane %v7243_v24, %v7237_v36 }
 0x130   : > { %v3244_v9 = vrot.slane %v7244_v19, %v7235_v34  ;;  %v3248_v57 = vrot.slane %v7244_v19, %v7237_v36  ;;  %v3252_v60 = vrot.slane %v7245_v1, %v7235_v34  ;;  %v3256_v58 = vrot.slane %v7245_v1, %v7237_v36 }
 0x131   : > { %v3260_v47 = vrot.slane %v7246_v33, %v7235_v34  ;;  %v3264_v11 = vrot.slane %v7246_v33, %v7237_v36  ;;  %v3268_v27 = vrot.slane %v7247_v44, %v7235_v34  ;;  %v3272_v0 = vrot.slane %v7247_v44, %v7237_v36 }
 0x132   : > { %v3276_v43 = vrot.slane %v7248_v26, %v7235_v34  ;;  %v3280_v2 = vrot.slane %v7248_v26, %v7237_v36  ;;  %v3284_v32 = vrot.slane %v7249_v39, %v7235_v34  ;;  %v3288_v23 = vrot.slane %v7249_v39, %v7237_v36  ;;  %v4200_v39 = vld [vmem:[%s5274_s20 + $0x310] sm:$0xff] }
 0x133   : > { %v3292_v50 = vrot.slane %v7250_v28, %v7235_v34  ;;  %v3296_v51 = vrot.slane %v7250_v28, %v7237_v36  ;;  %v3300_v10 = vrot.slane %v7251_v12, %v7235_v34  ;;  %v3304_v61 = vrot.slane %v7251_v12, %v7237_v36  ;;  %v4202_v12 = vld [vmem:[%s5274_s20 + $0x320] sm:$0xff] }
 0x134   : > { %v3308_v30 = vrot.slane %v7252_v20, %v7235_v34  ;;  %v3312_v46 = vrot.slane %v7252_v20, %v7237_v36  ;;  %v6287_v56 = vrot.slane %v3188_v3, %v7235_v34  ;;  %v6290_v21 = vrot.slane %v3192_v16, %v7235_v34 }
 0x135   : > { %v6293_v59 = vrot.slane %v3196_v25, %v7235_v34  ;;  %v6296_v53 = vrot.slane %v3200_v29, %v7235_v34  ;;  %v6299_v24 = vrot.slane %v3204_v38, %v7235_v34  ;;  %v3368_v19 = vrot.slane %v3208_v37, %v7235_v34 }
 0x136   : > { %v3372_v1 = vrot.slane %v3212_v6, %v7235_v34  ;;  %v3376_v33 = vrot.slane %v3216_v14, %v7235_v34  ;;  %v3380_v3 = vrot.slane %v3220_v52, %v7235_v34  ;;  %v3384_v16 = vrot.slane %v3224_v22, %v7235_v34 }
 0x137   : > { %v3388_v44 = vrot.slane %v3228_v63, %v7235_v34  ;;  %v3392_v25 = vrot.slane %v3232_v13, %v7235_v34  ;;  %v3396_v29 = vrot.slane %v3236_v49, %v7235_v34  ;;  %v3400_v38 = vrot.slane %v3240_v35, %v7235_v34 }
 0x138   : > { %v3404_v26 = vrot.slane %v3244_v9, %v7235_v34  ;;  %v3408_v37 = vrot.slane %v3248_v57, %v7235_v34  ;;  %v3412_v6 = vrot.slane %v3252_v60, %v7235_v34  ;;  %v3416_v14 = vrot.slane %v3256_v58, %v7235_v34 }
 0x139   : > { %v3420_v52 = vrot.slane %v3260_v47, %v7235_v34  ;;  %v3424_v22 = vrot.slane %v3264_v11, %v7235_v34  ;;  %v3428_v63 = vrot.slane %v3268_v27, %v7235_v34  ;;  %v3432_v13 = vrot.slane %v3272_v0, %v7235_v34  ;;  %v4198_v47 = vld [vmem:[%s5274_s20 + $0x300] sm:$0xff] }
 0x13a   : > { %v3436_v49 = vrot.slane %v3276_v43, %v7235_v34  ;;  %v3440_v35 = vrot.slane %v3280_v2, %v7235_v34  ;;  %v3444_v9 = vrot.slane %v3284_v32, %v7235_v34  ;;  %v3448_v57 = vrot.slane %v3288_v23, %v7235_v34  ;;  %v4199_v2 = vld [vmem:[%s5274_s20 + $0x308] sm:$0xff]  ;;  %v4201_v32 = vld [vmem:[%s5274_s20 + $0x318] sm:$0xff] }
 0x13b   : > { %v3452_v60 = vrot.slane %v3292_v50, %v7235_v34  ;;  %v3456_v58 = vrot.slane %v3296_v51, %v7235_v34  ;;  %v3460_v11 = vrot.slane %v3300_v10, %v7235_v34  ;;  %v3464_v27 = vrot.slane %v3304_v61, %v7235_v34  ;;  %v4203_v10 = vld [vmem:[%s5274_s20 + $0x328] sm:$0xff]  ;;  %v4204_v61 = vld [vmem:[%s5274_s20 + $0x330] sm:$0xff] }
 0x13c   : > { %v3468_v0 = vrot.slane %v3308_v30, %v7235_v34  ;;  %v3472_v43 = vrot.slane %v3312_v46, %v7235_v34  ;;  %v3505_v23 = vcombine.low %v6287_v56, %v6290_v21  ;;  %v3506_v28 = vcombine.low %v6293_v59, %v6296_v53  ;;  %v4205_v34 = vld [vmem:[%s5274_s20 + $0x338] sm:$0xff]  ;;  %v4206_v56 = vld [vmem:[%s5274_s20 + $0x340] sm:$0xff]  ;;  %v4207_v21 = vld [vmem:[%s5274_s20 + $0x348] sm:$0xff] }
 0x13d   : > { %v3507_v50 = vcombine.low %v6299_v24, %v3368_v19  ;;  %v3508_v51 = vcombine.low %v3372_v1, %v3376_v33  ;;  %v3509_v20 = vcombine.low %v3380_v3, %v3384_v16  ;;  %v3510_v30 = vcombine.low %v3388_v44, %v3392_v25  ;;  %v4208_v1 = vld [vmem:[%s5274_s20 + $0x350] sm:$0xff]  ;;  %v4209_v33 = vld [vmem:[%s5274_s20 + $0x358] sm:$0xff]  ;;  %v4211_v16 = vld [vmem:[%s5274_s20 + $0x368] sm:$0xff] }
 0x13e   : > { %v3511_v46 = vcombine.low %v3396_v29, %v3400_v38  ;;  %v3512_v36 = vcombine.low %v3404_v26, %v3408_v37  ;;  %v3513_v59 = vcombine.low %v3412_v6, %v3416_v14  ;;  %v3514_v53 = vcombine.low %v3420_v52, %v3424_v22  ;;  %v4212_v44 = vld [vmem:[%s5274_s20 + $0x370] sm:$0xff]  ;;  %v4213_v25 = vld [vmem:[%s5274_s20 + $0x378] sm:$0xff] }
 0x13f   : > { %v3515_v24 = vcombine.low %v3428_v63, %v3432_v13  ;;  %v3516_v19 = vcombine.low %v3436_v49, %v3440_v35  ;;  %v3517_v18 = vcombine.low %v3444_v9, %v3448_v57  ;;  %v3518_v8 = vcombine.low %v3452_v60, %v3456_v58 }
 0x140   : > { %v3519_v48 = vcombine.low %v3460_v11, %v3464_v27  ;;  %v3520_v3 = vcombine.low %v3468_v0, %v3472_v43  ;;  %v3537_v29 = vmul.f32 %v4198_v47, %v3505_v23  ;;  %v3538_v38 = vmul.f32 %v4199_v2, %v3506_v28  ;;  %v7265_v0 = vld [vmem:[#allocation7_spill] sm:$0xff] }
 0x141   : > { %v3539_v26 = vmul.f32 %v4200_v39, %v3507_v50  ;;  %v3540_v37 = vmul.f32 %v4201_v32, %v3508_v51  ;;  %v3541_v41 = vmul.f32 %v4202_v12, %v3509_v20  ;;  %v3542_v42 = vmul.f32 %v4203_v10, %v3510_v30  ;;  %v7266_v2 = vld [vmem:[#allocation3_spill] sm:$0xff]  ;;  %v7267_v32 = vld [vmem:[#allocation96_spill] sm:$0xff]  ;;  %v7269_v10 = vld [vmem:[#allocation97_spill] sm:$0xff] }
 0x142   : > { %v3543_v6 = vmul.f32 %v4204_v61, %v3511_v46  ;;  %v3544_v14 = vmul.f32 %v4205_v34, %v3512_v36  ;;  %v3545_v52 = vmul.f32 %v4206_v56, %v3513_v59  ;;  %v3546_v22 = vmul.f32 %v4207_v21, %v3514_v53  ;;  %v7268_v50 = vld [vmem:[#allocation8_spill] sm:$0xff]  ;;  %v7270_v30 = vld [vmem:[#allocation98_spill] sm:$0xff]  ;;  %v7271_v21 = vld [vmem:[#allocation35_spill] sm:$0xff] }
 0x143   : > { %v3547_v63 = vmul.f32 %v4208_v1, %v3515_v24  ;;  %v3548_v13 = vmul.f32 %v4209_v33, %v3516_v19  ;;  %v3549_v49 = vmul.f32 %v4210_v45, %v3517_v18  ;;  %v3550_v35 = vmul.f32 %v4211_v16, %v3518_v8  ;;  %v7272_v24 = vld [vmem:[#allocation36_spill] sm:$0xff]  ;;  %v7273_v33 = vld [vmem:[#allocation123_spill] sm:$0xff] }
 0x144   : > { %v3551_v9 = vmul.f32 %v4212_v44, %v3519_v48  ;;  %v3552_v57 = vmul.f32 %v4213_v25, %v3520_v3  ;;  %v6350_v60 = vadd.f32 %v3537_v29, %v6175_v17  ;;  %v6353_v58 = vadd.f32 %v3538_v38, %v6178_v40  ;;  %v7274_v44 = vld [vmem:[#allocation124_spill] sm:$0xff]  ;;  %v7275_v38 = vld [vmem:[#allocation125_spill] sm:$0xff] }
 0x145   : > { %v6356_v47 = vadd.f32 %v3539_v26, %v6181_v5  ;;  %v6359_v11 = vadd.f32 %v3540_v37, %v6184_v55  ;;  %v6362_v34 = vadd.f32 %v3541_v41, %v6187_v7  ;;  %v6365_v18 = vadd.f32 %v3542_v42, %v6190_v15  ;;  %v7253_v55 = vld [vmem:[#allocation81_spill] sm:$0xff]  ;;  %v7254_v7 = vld [vmem:[#allocation82_spill] sm:$0xff]  ;;  %v7256_v15 = vld [vmem:[#allocation51_spill] sm:$0xff] }
 0x146   : > { %v6368_v48 = vadd.f32 %v3543_v6, %v6193_v4  ;;  %v6371_v17 = vadd.f32 %v3544_v14, %v6196_v62  ;;  %v6374_v40 = vadd.f32 %v3545_v52, %v6199_v31  ;;  %v6377_v5 = vadd.f32 %v3546_v22, %v6202_v54  ;;  %v7258_v4 = vld [vmem:[#allocation52_spill] sm:$0xff]  ;;  %v7260_v62 = vld [vmem:[#allocation53_spill] sm:$0xff]  ;;  %v7262_v31 = vld [vmem:[#allocation54_spill] sm:$0xff] }
 0x147   : > { %v6380_v8 = vadd.f32 %v3547_v63, %v7253_v55  ;;  %v6383_v41 = vadd.f32 %v3548_v13, %v7254_v7  ;;  %v6386_v42 = vadd.f32 %v3549_v49, %v7256_v15  ;;  %v6389_v45 = vadd.f32 %v3550_v35, %v7258_v4  ;;  %v7264_v54 = vld [vmem:[#allocation2_spill] sm:$0xff]  ;;  %v7277_v22 = vld [vmem:[#allocation127_spill] sm:$0xff]  ;;  %v7278_v49 = vld [vmem:[#allocation128_spill] sm:$0xff] }
 0x148   : > { %v6392_v36 = vadd.f32 %v3551_v9, %v7260_v62  ;;  %v6395_v27 = vadd.f32 %v3552_v57, %v7262_v31  ;;  %v3605_v43 = vrot.slane %v7265_v0, %v7264_v54  ;;  %v3609_v39 = vrot.slane %v7265_v0, %v7266_v2  ;;  %v7276_v6 = vld [vmem:[#allocation126_spill] sm:$0xff]  ;;  %v7279_v57 = vld [vmem:[#allocation129_spill] sm:$0xff]  ;;  %v7281_v31 = vld [vmem:[#allocation131_spill] sm:$0xff] }
 0x149   : > { %7255 = vst [vmem:[#allocation55_spill] sm:$0xff] %v6383_v41  ;;  %7257 = vst [vmem:[#allocation56_spill] sm:$0xff] %v6386_v42  ;;  %v3613_v23 = vrot.slane %v7267_v32, %v7264_v54  ;;  %v3617_v28 = vrot.slane %v7267_v32, %v7266_v2  ;;  %v3621_v51 = vrot.slane %v7268_v50, %v7264_v54  ;;  %v7280_v15 = vld [vmem:[#allocation130_spill] sm:$0xff] }
 0x14a   : > { %7259 = vst [vmem:[#allocation10_spill] sm:$0xff] %v6389_v45  ;;  %7261 = vst [vmem:[#allocation11_spill] sm:$0xff] %v6392_v36  ;;  %v3625_v12 = vrot.slane %v7268_v50, %v7266_v2  ;;  %v3629_v61 = vrot.slane %v7269_v10, %v7264_v54  ;;  %v3633_v20 = vrot.slane %v7269_v10, %v7266_v2 }
 0x14b   : > { %7263 = vst [vmem:[#allocation12_spill] sm:$0xff] %v6395_v27  ;;  %v3637_v46 = vrot.slane %v7270_v30, %v7264_v54  ;;  %v3641_v56 = vrot.slane %v7270_v30, %v7266_v2  ;;  %v3645_v59 = vrot.slane %v7271_v21, %v7264_v54  ;;  %v3649_v53 = vrot.slane %v7271_v21, %v7266_v2  ;;  %v4226_v27 = vld [vmem:[%s5274_s20 + $0x3e0] sm:$0xff] }
 0x14c   : > { %v3653_v19 = vrot.slane %v7272_v24, %v7264_v54  ;;  %v3657_v1 = vrot.slane %v7272_v24, %v7266_v2  ;;  %v3661_v3 = vrot.slane %v7273_v33, %v7264_v54  ;;  %v3665_v16 = vrot.slane %v7273_v33, %v7266_v2 }
 0x14d   : > { %v3669_v25 = vrot.slane %v7274_v44, %v7264_v54  ;;  %v3673_v29 = vrot.slane %v7274_v44, %v7266_v2  ;;  %v3677_v26 = vrot.slane %v7275_v38, %v7264_v54  ;;  %v3681_v37 = vrot.slane %v7275_v38, %v7266_v2 }
 0x14e   : > { %v3685_v14 = vrot.slane %v7276_v6, %v7264_v54  ;;  %v3689_v52 = vrot.slane %v7276_v6, %v7266_v2  ;;  %v3693_v63 = vrot.slane %v7277_v22, %v7264_v54  ;;  %v3697_v13 = vrot.slane %v7277_v22, %v7266_v2 }
 0x14f   : > { %v3701_v35 = vrot.slane %v7278_v49, %v7264_v54  ;;  %v3705_v9 = vrot.slane %v7278_v49, %v7266_v2  ;;  %v3709_v55 = vrot.slane %v7279_v57, %v7264_v54  ;;  %v3713_v7 = vrot.slane %v7279_v57, %v7266_v2  ;;  %v4217_v49 = vld [vmem:[%s5274_s20 + $0x398] sm:$0xff] }
 0x150   : > { %v3717_v4 = vrot.slane %v7280_v15, %v7264_v54  ;;  %v3721_v62 = vrot.slane %v7280_v15, %v7266_v2  ;;  %v3725_v0 = vrot.slane %v7281_v31, %v7264_v54  ;;  %v3729_v32 = vrot.slane %v7281_v31, %v7266_v2  ;;  %v4219_v15 = vld [vmem:[%s5274_s20 + $0x3a8] sm:$0xff] }
 0x151   : > { %v6462_v50 = vrot.slane %v3605_v43, %v7264_v54  ;;  %v6465_v10 = vrot.slane %v3609_v39, %v7264_v54  ;;  %v6468_v30 = vrot.slane %v3613_v23, %v7264_v54  ;;  %v6471_v21 = vrot.slane %v3617_v28, %v7264_v54 }
 0x152   : > { %v6474_v24 = vrot.slane %v3621_v51, %v7264_v54  ;;  %v3785_v33 = vrot.slane %v3625_v12, %v7264_v54  ;;  %v3789_v44 = vrot.slane %v3629_v61, %v7264_v54  ;;  %v3793_v2 = vrot.slane %v3633_v20, %v7264_v54 }
 0x153   : > { %v3797_v43 = vrot.slane %v3637_v46, %v7264_v54  ;;  %v3801_v39 = vrot.slane %v3641_v56, %v7264_v54  ;;  %v3805_v38 = vrot.slane %v3645_v59, %v7264_v54  ;;  %v3809_v23 = vrot.slane %v3649_v53, %v7264_v54 }
 0x154   : > { %v3813_v28 = vrot.slane %v3653_v19, %v7264_v54  ;;  %v3817_v51 = vrot.slane %v3657_v1, %v7264_v54  ;;  %v3821_v6 = vrot.slane %v3661_v3, %v7264_v54  ;;  %v3825_v12 = vrot.slane %v3665_v16, %v7264_v54 }
 0x155   : > { %v3829_v61 = vrot.slane %v3669_v25, %v7264_v54  ;;  %v3833_v20 = vrot.slane %v3673_v29, %v7264_v54  ;;  %v3837_v46 = vrot.slane %v3677_v26, %v7264_v54  ;;  %v3841_v56 = vrot.slane %v3681_v37, %v7264_v54  ;;  %v4214_v26 = vld [vmem:[%s5274_s20 + $0x380] sm:$0xff] }
 0x156   : > { %v3845_v59 = vrot.slane %v3685_v14, %v7264_v54  ;;  %v3849_v53 = vrot.slane %v3689_v52, %v7264_v54  ;;  %v3853_v19 = vrot.slane %v3693_v63, %v7264_v54  ;;  %v3857_v1 = vrot.slane %v3697_v13, %v7264_v54  ;;  %v4215_v63 = vld [vmem:[%s5274_s20 + $0x388] sm:$0xff]  ;;  %v4216_v13 = vld [vmem:[%s5274_s20 + $0x390] sm:$0xff] }
 0x157   : > { %v3861_v3 = vrot.slane %v3701_v35, %v7264_v54  ;;  %v3865_v16 = vrot.slane %v3705_v9, %v7264_v54  ;;  %v3869_v25 = vrot.slane %v3709_v55, %v7264_v54  ;;  %v3873_v29 = vrot.slane %v3713_v7, %v7264_v54  ;;  %v4218_v7 = vld [vmem:[%s5274_s20 + $0x3a0] sm:$0xff] }
 0x158   : > { %v3877_v37 = vrot.slane %v3717_v4, %v7264_v54  ;;  %v3881_v14 = vrot.slane %v3721_v62, %v7264_v54  ;;  %v3885_v52 = vrot.slane %v3725_v0, %v7264_v54  ;;  %v3889_v22 = vrot.slane %v3729_v32, %v7264_v54  ;;  %v4220_v54 = vld [vmem:[%s5274_s20 + $0x3b0] sm:$0xff]  ;;  %v4221_v32 = vld [vmem:[%s5274_s20 + $0x3b8] sm:$0xff] }
 0x159   : > { %v3922_v35 = vcombine.low %v6462_v50, %v6465_v10  ;;  %v3923_v9 = vcombine.low %v6468_v30, %v6471_v21  ;;  %v3924_v57 = vcombine.low %v6474_v24, %v3785_v33  ;;  %v3925_v55 = vcombine.low %v3789_v44, %v3793_v2  ;;  %v4222_v50 = vld [vmem:[%s5274_s20 + $0x3c0] sm:$0xff]  ;;  %v4223_v10 = vld [vmem:[%s5274_s20 + $0x3c8] sm:$0xff]  ;;  %v4224_v44 = vld [vmem:[%s5274_s20 + $0x3d0] sm:$0xff] }
 0x15a   : > { %v3926_v4 = vcombine.low %v3797_v43, %v3801_v39  ;;  %v3927_v62 = vcombine.low %v3805_v38, %v3809_v23  ;;  %v3928_v31 = vcombine.low %v3813_v28, %v3817_v51  ;;  %v3929_v0 = vcombine.low %v3821_v6, %v3825_v12  ;;  %v4225_v2 = vld [vmem:[%s5274_s20 + $0x3d8] sm:$0xff]  ;;  %v4227_v39 = vld [vmem:[%s5274_s20 + $0x3e8] sm:$0xff]  ;;  %v4228_v38 = vld [vmem:[%s5274_s20 + $0x3f0] sm:$0xff] }
 0x15b   : > { %v3930_v30 = vcombine.low %v3829_v61, %v3833_v20  ;;  %v3931_v21 = vcombine.low %v3837_v46, %v3841_v56  ;;  %v3932_v24 = vcombine.low %v3845_v59, %v3849_v53  ;;  %v3933_v33 = vcombine.low %v3853_v19, %v3857_v1  ;;  %v4229_v23 = vld [vmem:[%s5274_s20 + $0x3f8] sm:$0xff] }
 0x15c   : > { %v3934_v36 = vcombine.low %v3861_v3, %v3865_v16  ;;  %v3935_v45 = vcombine.low %v3869_v25, %v3873_v29  ;;  %v3936_v42 = vcombine.low %v3877_v37, %v3881_v14  ;;  %v3937_v43 = vcombine.low %v3885_v52, %v3889_v22 }
 0x15d   : > { %v3954_v28 = vmul.f32 %v4214_v26, %v3922_v35  ;;  %v3955_v51 = vmul.f32 %v4215_v63, %v3923_v9  ;;  %v3956_v6 = vmul.f32 %v4216_v13, %v3924_v57  ;;  %v3957_v12 = vmul.f32 %v4217_v49, %v3925_v55 }
 0x15e   : > { %v3958_v41 = vmul.f32 %v4218_v7, %v3926_v4  ;;  %v3959_v61 = vmul.f32 %v4219_v15, %v3927_v62  ;;  %v3960_v20 = vmul.f32 %v4220_v54, %v3928_v31  ;;  %v3961_v46 = vmul.f32 %v4221_v32, %v3929_v0 }
 0x15f   : > { %v3962_v56 = vmul.f32 %v4222_v50, %v3930_v30  ;;  %v3963_v59 = vmul.f32 %v4223_v10, %v3931_v21  ;;  %v3964_v53 = vmul.f32 %v4224_v44, %v3932_v24  ;;  %v3965_v19 = vmul.f32 %v4225_v2, %v3933_v33 }
 0x160   : > { %v3966_v1 = vmul.f32 %v4226_v27, %v3934_v36  ;;  %v3967_v3 = vmul.f32 %v4227_v39, %v3935_v45  ;;  %v3968_v16 = vmul.f32 %v4228_v38, %v3936_v42  ;;  %v3969_v25 = vmul.f32 %v4229_v23, %v3937_v43  ;;  %v7286_v27 = vld [vmem:[#allocation12_spill] sm:$0xff] }
 0x161   : > { %v3970_v29 = vadd.f32 %v3954_v28, %v6350_v60  ;;  %v3971_v26 = vadd.f32 %v3955_v51, %v6353_v58  ;;  %v3972_v37 = vadd.f32 %v3956_v6, %v6356_v47  ;;  %v3973_v14 = vadd.f32 %v3957_v12, %v6359_v11  ;;  %v7282_v11 = vld [vmem:[#allocation55_spill] sm:$0xff] }
 0x162   : > { %v3974_v52 = vadd.f32 %v3958_v41, %v6362_v34  ;;  %v3975_v36 = vadd.f32 %v3959_v61, %v6365_v18  ;;  %v3976_v45 = vadd.f32 %v3960_v20, %v6368_v48  ;;  %v3977_v42 = vadd.f32 %v3961_v46, %v6371_v17  ;;  %v7283_v18 = vld [vmem:[#allocation56_spill] sm:$0xff]  ;;  %v7284_v17 = vld [vmem:[#allocation10_spill] sm:$0xff] }
 0x163   : > { %v3978_v60 = vadd.f32 %v3962_v56, %v6374_v40  ;;  %v3979_v58 = vadd.f32 %v3963_v59, %v6377_v5  ;;  %v3980_v47 = vadd.f32 %v3964_v53, %v6380_v8  ;;  %v3981_v34 = vadd.f32 %v3965_v19, %v7282_v11  ;;  %3986 = vst [vmem:[%s6529_s23] sm:$0xff] %v3970_v29  ;;  %v7285_v5 = vld [vmem:[#allocation11_spill] sm:$0xff] }
 0x164   : > { %3987 = vst [vmem:[%s6529_s23 + $0x8] sm:$0xff] %v3971_v26  ;;  %3988 = vst [vmem:[%s6529_s23 + $0x10] sm:$0xff] %v3972_v37  ;;  %v3982_v48 = vadd.f32 %v3966_v1, %v7283_v18  ;;  %v3983_v40 = vadd.f32 %v3967_v3, %v7284_v17  ;;  %v3984_v41 = vadd.f32 %v3968_v16, %v7285_v5 }
 0x165   : > { %3989 = vst [vmem:[%s6529_s23 + $0x18] sm:$0xff] %v3973_v14  ;;  %v3985_v8 = vadd.f32 %v3969_v25, %v7286_v27  ;;  %3990 = vst [vmem:[%s6529_s23 + $0x20] sm:$0xff] %v3974_v52 }
 0x166   : > { %3991 = vst [vmem:[%s6529_s23 + $0x28] sm:$0xff] %v3975_v36  ;;  %3992 = vst [vmem:[%s6529_s23 + $0x30] sm:$0xff] %v3976_v45 }
 0x167   : > { %3993 = vst [vmem:[%s6529_s23 + $0x38] sm:$0xff] %v3977_v42  ;;  %3994 = vst [vmem:[%s6529_s23 + $0x40] sm:$0xff] %v3978_v60 }
 0x168   : > { %3995 = vst [vmem:[%s6529_s23 + $0x48] sm:$0xff] %v3979_v58  ;;  %3996 = vst [vmem:[%s6529_s23 + $0x50] sm:$0xff] %v3980_v47 }
 0x169   : > { %3997 = vst [vmem:[%s6529_s23 + $0x58] sm:$0xff] %v3981_v34  ;;  %3998 = vst [vmem:[%s6529_s23 + $0x60] sm:$0xff] %v3982_v48 }
 0x16a   : > { %3999 = vst [vmem:[%s6529_s23 + $0x68] sm:$0xff] %v3983_v40  ;;  %4000 = vst [vmem:[%s6529_s23 + $0x70] sm:$0xff] %v3984_v41 }
 0x16b   : > { %4001 = vst [vmem:[%s6529_s23 + $0x78] sm:$0xff] %v3985_v8 }
 0x16c PF: > { %s12_s11 = sadd.s32 1, %s4281_s11   ;;  %s7287_s9 = smov %s4277_s10 }
 0x16d   : > { %p9_p5 = scmp.ge.s32.totalorder %s12_s11, 4   ;;  %s7288_s10 = smov %s7290_s12 }
 0x16f   :  { %11 = sbr.rel (!%p9_p5) target bundleno = 2 (0x2), region = 68 }

</bundles_post_ra>
